<compile_context>
chip_gen: v7x
topology: tpu7x:2x2x1
jax: 0.10.0
libtpu: 0.0.40
codegen_flags: <defaults>
</compile_context>

<pallas_src>
import functools

import jax
import jax.numpy as jnp
import numpy as np
from jax.experimental import pallas as pl
from jax.experimental.pallas import tpu as pltpu


def _round_up(n, m):
    return ((n + m - 1) // m) * m


def _col_layout(in_dim, trunk, num_hiddens, out_dim, atom_pad):
    """128-aligned column offsets of the packed weight / bias(+support) buffers."""
    T, H, Ap = trunk, num_hiddens, atom_pad
    widths = (T, T, H, H, out_dim * Ap, Ap, Ap)   # w1,w2,wah,wvh,wa,wv,support
    offs, c = [], 0
    for w in widths:
        offs.append(c)
        c += w
    rows = max(_round_up(in_dim, 8), T, H)
    return tuple(offs), rows


def rainbow_kernel(x_ref, w_ref, b_ref, q_ref, *,
                   in_dim, trunk, num_hiddens, out_dim, atom_size, atom_pad,
                   col_offsets):
    f32, bf16 = jnp.float32, jnp.bfloat16
    T, H, A, Ap = trunk, num_hiddens, atom_size, atom_pad
    o_w1, o_w2, o_ah, o_vh, o_a, o_v, o_sup = col_offsets

    def dense(h, off, width, rows):
        # bf16 x bf16 MXU matmul, f32 accumulation, f32 bias add.
        w = w_ref[:rows, off:off + width]
        b = b_ref[:, off:off + width]
        return jnp.dot(h.astype(bf16), w, preferred_element_type=f32) + b

    relu = lambda v: jnp.maximum(v, 0.0)

    x = x_ref[...]                                      # already bf16
    # Trunk: Flatten -> Linear -> ReLU -> Linear -> ReLU
    h1 = relu(dense(x, o_w1, T, in_dim))                # (TB, T)
    feat = relu(dense(h1, o_w2, T, T))                  # (TB, T)

    # Fused noisy hidden heads: one (T, 2H) matmul, lane-aligned split.
    heads = relu(dense(feat, o_ah, 2 * H, T))           # (TB, 2H)
    adv_hid, val_hid = heads[:, :H], heads[:, H:]

    # Wide heads: all actions in one matmul; each atom slab is Ap(=128) lanes.
    adv_all = dense(adv_hid, o_a, out_dim * Ap, H)      # (TB, out_dim*Ap)
    value = dense(val_hid, o_v, Ap, H)                  # (TB, Ap)

    slabs = [adv_all[:, o * Ap:(o + 1) * Ap] for o in range(out_dim)]
    vm = value - sum(slabs) * (1.0 / out_dim)           # value - mean(advantage)

    sup = b_ref[:, o_sup:o_sup + Ap]                    # (1, Ap), zero pad lanes
    atom_mask = jax.lax.broadcasted_iota(jnp.int32, (1, Ap), 1) < A
    neg_big = jnp.float32(-1e30)

    q_cols = []
    for o in range(out_dim):
        # Pad atom lanes are forced to -1e30 so they vanish from the softmax.
        qa = jnp.where(atom_mask, slabs[o] + vm, neg_big)        # (TB, Ap)
        e = jnp.exp(qa - jnp.max(qa, axis=-1, keepdims=True))
        inv = pl.reciprocal(jnp.sum(e, axis=-1, keepdims=True), approx=True)
        dist = jnp.maximum(e * inv, 0.001)                       # clamp(min=0.001)
        q_cols.append(jnp.sum(dist * sup, axis=-1, keepdims=True))
    q_ref[...] = jnp.concatenate(q_cols, axis=-1)                # (TB, out_dim)


def rainbow_forward(x, params, *, block_b=512):
    d = params["dims"]
    B = x.shape[0]
    assert x.shape[1] == d["in_dim"]

    # Batch tiling: bf16 activations pack 16 sublanes/vreg -> tiles are
    # multiples of 16.  Keep >=2 grid steps whenever the batch spans more than
    # one minimal tile so the "parallel" axis can shard across both v7x TCs.
    b16 = _round_up(B, 16)
    tb = min(block_b, b16)
    if b16 > 16 and tb >= b16:
        tb = _round_up((b16 + 1) // 2, 16)
    Bp = _round_up(B, tb)

    x = x.astype(jnp.bfloat16)
    if Bp != B:
        x = jnp.pad(x, ((0, Bp - B), (0, 0)))

    wpk, bpk = params["w_packed"], params["b_packed"]
    kernel = functools.partial(
        rainbow_kernel,
        in_dim=d["in_dim"], trunk=d["trunk"], num_hiddens=d["num_hiddens"],
        out_dim=d["out_dim"], atom_size=d["atom_size"], atom_pad=d["atom_pad"],
        col_offsets=d["col_offsets"])

    q = pl.pallas_call(
        kernel,
        grid=(Bp // tb,),
        in_specs=[
            pl.BlockSpec((tb, d["in_dim"]), lambda i: (i, 0)),   # streamed x
            pl.BlockSpec(wpk.shape, lambda i: (0, 0)),           # resident weights
            pl.BlockSpec(bpk.shape, lambda i: (0, 0)),           # resident biases+support
        ],
        out_specs=pl.BlockSpec((tb, d["out_dim"]), lambda i: (i, 0)),
        out_shape=jax.ShapeDtypeStruct((Bp, d["out_dim"]), jnp.float32),
        compiler_params=pltpu.CompilerParams(
            dimension_semantics=("parallel",),
            vmem_limit_bytes=32 * 1024 * 1024),
    )(x, wpk, bpk)
    return q[:B]


def make_params(key, in_dim, out_dim, atom_size, support, num_hiddens,
                trunk=256, atom_pad=128):
    """Deterministic synthetic parameters, packed for the kernel.

    Weights are bf16 (in, out); every atom block of the advantage/value heads
    is placed at a 128-lane-aligned slot (zero padding); all weights live in
    one (rows, cols) bf16 buffer and all biases + the zero-padded support in
    one (1, cols) f32 buffer.  Raw (unpacked) bf16 weights are kept for the
    pure-JAX reference.
    """
    assert num_hiddens == trunk, (
        "num_hiddens must equal the trunk feature width (256 for en_cnn=False)")
    assert atom_pad % 128 == 0 and atom_size <= atom_pad
    assert trunk % 128 == 0

    bf16, f32 = jnp.bfloat16, jnp.float32

    def lin(k, fan_in, fan_out, scale):
        kw, kb = jax.random.split(k)
        w = (scale * jax.random.normal(kw, (fan_in, fan_out), f32)).astype(bf16)
        b = 0.01 * jax.random.normal(kb, (fan_out,), f32)
        return w, b

    ks = jax.random.split(key, 6)
    w1, b1 = lin(ks[0], in_dim, trunk, 0.1)
    w2, b2 = lin(ks[1], trunk, trunk, 0.05)
    wah, bah = lin(ks[2], num_hiddens, num_hiddens, 0.05)
    wvh, bvh = lin(ks[3], num_hiddens, num_hiddens, 0.05)
    wa, ba = lin(ks[4], num_hiddens, out_dim * atom_size, 0.05)
    wv, bv = lin(ks[5], num_hiddens, atom_size, 0.05)

    raw = dict(w1=w1, b1=b1, w2=w2, b2=b2, wah=wah, bah=bah,
               wvh=wvh, bvh=bvh, wa=wa, ba=ba, wv=wv, bv=bv)

    offs, rows = _col_layout(in_dim, trunk, num_hiddens, out_dim, atom_pad)
    w_cols = offs[6]                 # weight buffer width
    b_cols = offs[6] + atom_pad      # + support slot

    wpk = np.zeros((rows, w_cols), np.float32)
    bpk = np.zeros((1, b_cols), np.float32)

    def to_np(a):
        return np.asarray(jnp.asarray(a, f32))

    # Trunk + fused hidden heads (adv then val): contiguous segments.
    wpk[:in_dim, offs[0]:offs[0] + trunk] = to_np(w1)
    bpk[0, offs[0]:offs[0] + trunk] = to_np(b1)
    wpk[:trunk, offs[1]:offs[1] + trunk] = to_np(w2)
    bpk[0, offs[1]:offs[1] + trunk] = to_np(b2)
    wpk[:trunk, offs[2]:offs[2] + num_hiddens] = to_np(wah)
    bpk[0, offs[2]:offs[2] + num_hiddens] = to_np(bah)
    wpk[:trunk, offs[3]:offs[3] + num_hiddens] = to_np(wvh)
    bpk[0, offs[3]:offs[3] + num_hiddens] = to_np(bvh)
    # Advantage head: each action's atom block at a lane-aligned atom_pad slot.
    wa_np, ba_np = to_np(wa), to_np(ba)
    for o in range(out_dim):
        dst = offs[4] + o * atom_pad
        wpk[:num_hiddens, dst:dst + atom_size] = wa_np[:, o * atom_size:(o + 1) * atom_size]
        bpk[0, dst:dst + atom_size] = ba_np[o * atom_size:(o + 1) * atom_size]
    # Value head (single atom block) + zero-padded support row.
    wpk[:num_hiddens, offs[5]:offs[5] + atom_size] = to_np(wv)
    bpk[0, offs[5]:offs[5] + atom_size] = to_np(bv)
    bpk[0, offs[6]:offs[6] + atom_size] = to_np(support)

    dims = dict(in_dim=in_dim, trunk=trunk, num_hiddens=num_hiddens,
                out_dim=out_dim, atom_size=atom_size, atom_pad=atom_pad,
                col_offsets=offs)
    return dict(w_packed=jnp.asarray(wpk, bf16),
                b_packed=jnp.asarray(bpk, f32),
                raw=raw, dims=dims)


def reference_forward(x, raw, support):
    """Pure-JAX reference mirroring the PyTorch forward() (same bf16 weights)."""
    f32, bf16 = jnp.float32, jnp.bfloat16

    def dense(h, w, b):
        return jnp.dot(h.astype(bf16), w, preferred_element_type=f32) + b

    relu = lambda v: jnp.maximum(v, 0.0)
    B = x.shape[0]
    A = support.shape[0]
    out_dim = raw["wa"].shape[1] // A

    h1 = relu(dense(x, raw["w1"], raw["b1"]))
    feat = relu(dense(h1, raw["w2"], raw["b2"]))
    adv_hid = relu(dense(feat, raw["wah"], raw["bah"]))
    val_hid = relu(dense(feat, raw["wvh"], raw["bvh"]))
    advantage = dense(adv_hid, raw["wa"], raw["ba"]).reshape(B, out_dim, A)
    value = dense(val_hid, raw["wv"], raw["bv"]).reshape(B, 1, A)
    q_atoms = value + advantage - advantage.mean(axis=1, keepdims=True)
    dist = jnp.clip(jax.nn.softmax(q_atoms, axis=-1), 0.001, None)
    return jnp.sum(dist * support[None, None, :], axis=2)


if __name__ == "__main__":
    # Small shapes consistent with the module (vector input path, en_cnn=False).
    # num_hiddens must equal 256 because the non-CNN trunk emits 256 features.
    B, in_dim, out_dim, atom_size, num_hiddens = 2, 64, 6, 51, 256

    key = jax.random.PRNGKey(0)
    k_x, k_p = jax.random.split(key)
    x = jax.random.normal(k_x, (B, in_dim), jnp.float32)
    support = jnp.linspace(-10.0, 10.0, atom_size, dtype=jnp.float32)
    params = make_params(k_p, in_dim, out_dim, atom_size, support, num_hiddens)

    q = jax.block_until_ready(rainbow_forward(x, params))
    q_ref = jax.block_until_ready(reference_forward(x, params["raw"], support))

    # Tolerance loosened vs a pure-f32 version: bf16 matmul inputs and the
    # approximate EUP reciprocal in the softmax denominator.
    np.testing.assert_allclose(np.asarray(q), np.asarray(q_ref),
                               rtol=5e-3, atol=5e-3)

    print("KERNEL_OK")
</pallas_src>

<mosaic_0001>
module attributes {stable_mosaic.version = 11 : i64} {
  func.func @rainbow_kernel(%arg0: i32, %arg1: memref<16x64xbf16, #tpu.memory_space<vmem>>, %arg2: memref<256x1920xbf16, #tpu.memory_space<vmem>>, %arg3: memref<1x2048xf32, #tpu.memory_space<vmem>>, %arg4: memref<16x6xf32, #tpu.memory_space<vmem>>) attributes {dimension_semantics = [#tpu.dimension_semantics<parallel>], iteration_bounds = array<i64: 1>, scalar_prefetch = 0 : i64, scratch_operands = 0 : i64, tpu.core_type = #tpu.core_type<tc>, window_params = [{transform_indices = @transform_0, window_bounds = array<i64: 16, 64>}, {pipeline_mode = #tpu.pipeline_mode<synchronous>, transform_indices = @transform_1, window_bounds = array<i64: 256, 1920>}, {pipeline_mode = #tpu.pipeline_mode<synchronous>, transform_indices = @transform_2, window_bounds = array<i64: 1, 2048>}, {transform_indices = @transform_3, window_bounds = array<i64: 16, 6>}]} {
    %c0 = arith.constant 0 : index
    %c0_0 = arith.constant 0 : index
    %0 = vector.load %arg1[%c0, %c0_0] : memref<16x64xbf16, #tpu.memory_space<vmem>>, vector<16x64xbf16>
    %c0_1 = arith.constant 0 : index
    %c0_2 = arith.constant 0 : index
    %1 = vector.load %arg2[%c0_1, %c0_2] : memref<256x1920xbf16, #tpu.memory_space<vmem>>, vector<64x256xbf16>
    %c0_3 = arith.constant 0 : index
    %c0_4 = arith.constant 0 : index
    %2 = vector.load %arg3[%c0_3, %c0_4] : memref<1x2048xf32, #tpu.memory_space<vmem>>, vector<1x256xf32>
    %cst = arith.constant dense<0.000000e+00> : vector<16x256xf32>
    %3 = tpu.matmul %0, %1, %cst {dimension_numbers = #tpu.dot_dimension_numbers<[1], [0], [0], [1], [0, 0, 1, 1], [], []>} : vector<16x64xbf16>, vector<64x256xbf16>, vector<16x256xf32> -> vector<16x256xf32>
    %4 = vector.broadcast %2 : vector<1x256xf32> to vector<16x256xf32>
    %5 = arith.addf %3, %4 : vector<16x256xf32>
    %cst_5 = arith.constant 0.000000e+00 : f32
    %6 = vector.broadcast %cst_5 : f32 to vector<16x256xf32>
    %7 = arith.maximumf %5, %6 : vector<16x256xf32>
    %c0_6 = arith.constant 0 : index
    %c256 = arith.constant 256 : index
    %8 = vector.load %arg2[%c0_6, %c256] : memref<256x1920xbf16, #tpu.memory_space<vmem>>, vector<256x256xbf16>
    %c0_7 = arith.constant 0 : index
    %c256_8 = arith.constant 256 : index
    %9 = vector.load %arg3[%c0_7, %c256_8] : memref<1x2048xf32, #tpu.memory_space<vmem>>, vector<1x256xf32>
    %10 = arith.truncf %7 : vector<16x256xf32> to vector<16x256xbf16>
    %cst_9 = arith.constant dense<0.000000e+00> : vector<16x256xf32>
    %11 = tpu.matmul %10, %8, %cst_9 {dimension_numbers = #tpu.dot_dimension_numbers<[1], [0], [0], [1], [0, 0, 1, 1], [], []>} : vector<16x256xbf16>, vector<256x256xbf16>, vector<16x256xf32> -> vector<16x256xf32>
    %12 = vector.broadcast %9 : vector<1x256xf32> to vector<16x256xf32>
    %13 = arith.addf %11, %12 : vector<16x256xf32>
    %cst_10 = arith.constant 0.000000e+00 : f32
    %14 = vector.broadcast %cst_10 : f32 to vector<16x256xf32>
    %15 = arith.maximumf %13, %14 : vector<16x256xf32>
    %c0_11 = arith.constant 0 : index
    %c512 = arith.constant 512 : index
    %16 = vector.load %arg2[%c0_11, %c512] : memref<256x1920xbf16, #tpu.memory_space<vmem>>, vector<256x512xbf16>
    %c0_12 = arith.constant 0 : index
    %c512_13 = arith.constant 512 : index
    %17 = vector.load %arg3[%c0_12, %c512_13] : memref<1x2048xf32, #tpu.memory_space<vmem>>, vector<1x512xf32>
    %18 = arith.truncf %15 : vector<16x256xf32> to vector<16x256xbf16>
    %cst_14 = arith.constant dense<0.000000e+00> : vector<16x512xf32>
    %19 = tpu.matmul %18, %16, %cst_14 {dimension_numbers = #tpu.dot_dimension_numbers<[1], [0], [0], [1], [0, 0, 1, 1], [], []>} : vector<16x256xbf16>, vector<256x512xbf16>, vector<16x512xf32> -> vector<16x512xf32>
    %20 = vector.broadcast %17 : vector<1x512xf32> to vector<16x512xf32>
    %21 = arith.addf %19, %20 : vector<16x512xf32>
    %cst_15 = arith.constant 0.000000e+00 : f32
    %22 = vector.broadcast %cst_15 : f32 to vector<16x512xf32>
    %23 = arith.maximumf %21, %22 : vector<16x512xf32>
    %24 = vector.extract_strided_slice %23 {offsets = [0, 0], sizes = [16, 256], strides = [1, 1]} : vector<16x512xf32> to vector<16x256xf32>
    %25 = vector.extract_strided_slice %23 {offsets = [0, 256], sizes = [16, 256], strides = [1, 1]} : vector<16x512xf32> to vector<16x256xf32>
    %c0_16 = arith.constant 0 : index
    %c1024 = arith.constant 1024 : index
    %26 = vector.load %arg2[%c0_16, %c1024] : memref<256x1920xbf16, #tpu.memory_space<vmem>>, vector<256x768xbf16>
    %c0_17 = arith.constant 0 : index
    %c1024_18 = arith.constant 1024 : index
    %27 = vector.load %arg3[%c0_17, %c1024_18] : memref<1x2048xf32, #tpu.memory_space<vmem>>, vector<1x768xf32>
    %28 = arith.truncf %24 : vector<16x256xf32> to vector<16x256xbf16>
    %cst_19 = arith.constant dense<0.000000e+00> : vector<16x768xf32>
    %29 = tpu.matmul %28, %26, %cst_19 {dimension_numbers = #tpu.dot_dimension_numbers<[1], [0], [0], [1], [0, 0, 1, 1], [], []>} : vector<16x256xbf16>, vector<256x768xbf16>, vector<16x768xf32> -> vector<16x768xf32>
    %30 = vector.broadcast %27 : vector<1x768xf32> to vector<16x768xf32>
    %31 = arith.addf %29, %30 : vector<16x768xf32>
    %c0_20 = arith.constant 0 : index
    %c1792 = arith.constant 1792 : index
    %32 = vector.load %arg2[%c0_20, %c1792] : memref<256x1920xbf16, #tpu.memory_space<vmem>>, vector<256x128xbf16>
    %c0_21 = arith.constant 0 : index
    %c1792_22 = arith.constant 1792 : index
    %33 = vector.load %arg3[%c0_21, %c1792_22] : memref<1x2048xf32, #tpu.memory_space<vmem>>, vector<1x128xf32>
    %34 = arith.truncf %25 : vector<16x256xf32> to vector<16x256xbf16>
    %cst_23 = arith.constant dense<0.000000e+00> : vector<16x128xf32>
    %35 = tpu.matmul %34, %32, %cst_23 {dimension_numbers = #tpu.dot_dimension_numbers<[1], [0], [0], [1], [0, 0, 1, 1], [], []>} : vector<16x256xbf16>, vector<256x128xbf16>, vector<16x128xf32> -> vector<16x128xf32>
    %36 = vector.broadcast %33 : vector<1x128xf32> to vector<16x128xf32>
    %37 = arith.addf %35, %36 : vector<16x128xf32>
    %38 = vector.extract_strided_slice %31 {offsets = [0, 0], sizes = [16, 128], strides = [1, 1]} : vector<16x768xf32> to vector<16x128xf32>
    %39 = vector.extract_strided_slice %31 {offsets = [0, 128], sizes = [16, 128], strides = [1, 1]} : vector<16x768xf32> to vector<16x128xf32>
    %40 = vector.extract_strided_slice %31 {offsets = [0, 256], sizes = [16, 128], strides = [1, 1]} : vector<16x768xf32> to vector<16x128xf32>
    %41 = vector.extract_strided_slice %31 {offsets = [0, 384], sizes = [16, 128], strides = [1, 1]} : vector<16x768xf32> to vector<16x128xf32>
    %42 = vector.extract_strided_slice %31 {offsets = [0, 512], sizes = [16, 128], strides = [1, 1]} : vector<16x768xf32> to vector<16x128xf32>
    %43 = vector.extract_strided_slice %31 {offsets = [0, 640], sizes = [16, 128], strides = [1, 1]} : vector<16x768xf32> to vector<16x128xf32>
    %cst_24 = arith.constant 0.000000e+00 : f32
    %44 = vector.broadcast %cst_24 : f32 to vector<16x128xf32>
    %45 = arith.addf %44, %38 : vector<16x128xf32>
    %46 = arith.addf %45, %39 : vector<16x128xf32>
    %47 = arith.addf %46, %40 : vector<16x128xf32>
    %48 = arith.addf %47, %41 : vector<16x128xf32>
    %49 = arith.addf %48, %42 : vector<16x128xf32>
    %50 = arith.addf %49, %43 : vector<16x128xf32>
    %cst_25 = arith.constant 0.166666672 : f32
    %51 = vector.broadcast %cst_25 : f32 to vector<16x128xf32>
    %52 = arith.mulf %50, %51 : vector<16x128xf32>
    %53 = arith.subf %37, %52 : vector<16x128xf32>
    %c0_26 = arith.constant 0 : index
    %c1920 = arith.constant 1920 : index
    %54 = vector.load %arg3[%c0_26, %c1920] : memref<1x2048xf32, #tpu.memory_space<vmem>>, vector<1x128xf32>
    %55 = tpu.iota {dimensions = array<i32: 1>} : vector<1x128xi32>
    %c51_i32 = arith.constant 51 : i32
    %56 = vector.broadcast %c51_i32 : i32 to vector<1x128xi32>
    %57 = arith.cmpi slt, %55, %56 : vector<1x128xi32>
    %58 = arith.addf %38, %53 : vector<16x128xf32>
    %cst_27 = arith.constant -1.000000e+30 : f32
    %59 = vector.shape_cast %57 : vector<1x128xi1> to vector<1x128xi1>
    %60 = vector.broadcast %59 : vector<1x128xi1> to vector<16x128xi1>
    %61 = vector.broadcast %cst_27 : f32 to vector<16x128xf32>
    %62 = arith.select %60, %58, %61 : vector<16x128xi1>, vector<16x128xf32>
    %cst_28 = arith.constant dense<0xFF800000> : vector<16xf32>
    %63 = vector.multi_reduction <maximumf>, %62, %cst_28 [1] : vector<16x128xf32> to vector<16xf32>
    %64 = vector.shape_cast %63 : vector<16xf32> to vector<16x1xf32>
    %65 = vector.broadcast %64 : vector<16x1xf32> to vector<16x128xf32>
    %66 = arith.subf %62, %65 : vector<16x128xf32>
    %67 = math.exp %66 : vector<16x128xf32>
    %cst_29 = arith.constant dense<0.000000e+00> : vector<16xf32>
    %68 = vector.multi_reduction <add>, %67, %cst_29 [1] : vector<16x128xf32> to vector<16xf32>
    %69 = vector.shape_cast %68 : vector<16xf32> to vector<16x1xf32>
    %70 = tpu.reciprocal %69 {approx = true} : vector<16x1xf32> -> vector<16x1xf32>
    %71 = vector.broadcast %70 : vector<16x1xf32> to vector<16x128xf32>
    %72 = arith.mulf %67, %71 : vector<16x128xf32>
    %cst_30 = arith.constant 1.000000e-03 : f32
    %73 = vector.broadcast %cst_30 : f32 to vector<16x128xf32>
    %74 = arith.maximumf %72, %73 : vector<16x128xf32>
    %75 = vector.broadcast %54 : vector<1x128xf32> to vector<16x128xf32>
    %76 = arith.mulf %74, %75 : vector<16x128xf32>
    %cst_31 = arith.constant dense<0.000000e+00> : vector<16xf32>
    %77 = vector.multi_reduction <add>, %76, %cst_31 [1] : vector<16x128xf32> to vector<16xf32>
    %78 = vector.shape_cast %77 : vector<16xf32> to vector<16x1xf32>
    %79 = arith.addf %39, %53 : vector<16x128xf32>
    %cst_32 = arith.constant -1.000000e+30 : f32
    %80 = vector.shape_cast %57 : vector<1x128xi1> to vector<1x128xi1>
    %81 = vector.broadcast %80 : vector<1x128xi1> to vector<16x128xi1>
    %82 = vector.broadcast %cst_32 : f32 to vector<16x128xf32>
    %83 = arith.select %81, %79, %82 : vector<16x128xi1>, vector<16x128xf32>
    %cst_33 = arith.constant dense<0xFF800000> : vector<16xf32>
    %84 = vector.multi_reduction <maximumf>, %83, %cst_33 [1] : vector<16x128xf32> to vector<16xf32>
    %85 = vector.shape_cast %84 : vector<16xf32> to vector<16x1xf32>
    %86 = vector.broadcast %85 : vector<16x1xf32> to vector<16x128xf32>
    %87 = arith.subf %83, %86 : vector<16x128xf32>
    %88 = math.exp %87 : vector<16x128xf32>
    %cst_34 = arith.constant dense<0.000000e+00> : vector<16xf32>
    %89 = vector.multi_reduction <add>, %88, %cst_34 [1] : vector<16x128xf32> to vector<16xf32>
    %90 = vector.shape_cast %89 : vector<16xf32> to vector<16x1xf32>
    %91 = tpu.reciprocal %90 {approx = true} : vector<16x1xf32> -> vector<16x1xf32>
    %92 = vector.broadcast %91 : vector<16x1xf32> to vector<16x128xf32>
    %93 = arith.mulf %88, %92 : vector<16x128xf32>
    %cst_35 = arith.constant 1.000000e-03 : f32
    %94 = vector.broadcast %cst_35 : f32 to vector<16x128xf32>
    %95 = arith.maximumf %93, %94 : vector<16x128xf32>
    %96 = vector.broadcast %54 : vector<1x128xf32> to vector<16x128xf32>
    %97 = arith.mulf %95, %96 : vector<16x128xf32>
    %cst_36 = arith.constant dense<0.000000e+00> : vector<16xf32>
    %98 = vector.multi_reduction <add>, %97, %cst_36 [1] : vector<16x128xf32> to vector<16xf32>
    %99 = vector.shape_cast %98 : vector<16xf32> to vector<16x1xf32>
    %100 = arith.addf %40, %53 : vector<16x128xf32>
    %cst_37 = arith.constant -1.000000e+30 : f32
    %101 = vector.shape_cast %57 : vector<1x128xi1> to vector<1x128xi1>
    %102 = vector.broadcast %101 : vector<1x128xi1> to vector<16x128xi1>
    %103 = vector.broadcast %cst_37 : f32 to vector<16x128xf32>
    %104 = arith.select %102, %100, %103 : vector<16x128xi1>, vector<16x128xf32>
    %cst_38 = arith.constant dense<0xFF800000> : vector<16xf32>
    %105 = vector.multi_reduction <maximumf>, %104, %cst_38 [1] : vector<16x128xf32> to vector<16xf32>
    %106 = vector.shape_cast %105 : vector<16xf32> to vector<16x1xf32>
    %107 = vector.broadcast %106 : vector<16x1xf32> to vector<16x128xf32>
    %108 = arith.subf %104, %107 : vector<16x128xf32>
    %109 = math.exp %108 : vector<16x128xf32>
    %cst_39 = arith.constant dense<0.000000e+00> : vector<16xf32>
    %110 = vector.multi_reduction <add>, %109, %cst_39 [1] : vector<16x128xf32> to vector<16xf32>
    %111 = vector.shape_cast %110 : vector<16xf32> to vector<16x1xf32>
    %112 = tpu.reciprocal %111 {approx = true} : vector<16x1xf32> -> vector<16x1xf32>
    %113 = vector.broadcast %112 : vector<16x1xf32> to vector<16x128xf32>
    %114 = arith.mulf %109, %113 : vector<16x128xf32>
    %cst_40 = arith.constant 1.000000e-03 : f32
    %115 = vector.broadcast %cst_40 : f32 to vector<16x128xf32>
    %116 = arith.maximumf %114, %115 : vector<16x128xf32>
    %117 = vector.broadcast %54 : vector<1x128xf32> to vector<16x128xf32>
    %118 = arith.mulf %116, %117 : vector<16x128xf32>
    %cst_41 = arith.constant dense<0.000000e+00> : vector<16xf32>
    %119 = vector.multi_reduction <add>, %118, %cst_41 [1] : vector<16x128xf32> to vector<16xf32>
    %120 = vector.shape_cast %119 : vector<16xf32> to vector<16x1xf32>
    %121 = arith.addf %41, %53 : vector<16x128xf32>
    %cst_42 = arith.constant -1.000000e+30 : f32
    %122 = vector.shape_cast %57 : vector<1x128xi1> to vector<1x128xi1>
    %123 = vector.broadcast %122 : vector<1x128xi1> to vector<16x128xi1>
    %124 = vector.broadcast %cst_42 : f32 to vector<16x128xf32>
    %125 = arith.select %123, %121, %124 : vector<16x128xi1>, vector<16x128xf32>
    %cst_43 = arith.constant dense<0xFF800000> : vector<16xf32>
    %126 = vector.multi_reduction <maximumf>, %125, %cst_43 [1] : vector<16x128xf32> to vector<16xf32>
    %127 = vector.shape_cast %126 : vector<16xf32> to vector<16x1xf32>
    %128 = vector.broadcast %127 : vector<16x1xf32> to vector<16x128xf32>
    %129 = arith.subf %125, %128 : vector<16x128xf32>
    %130 = math.exp %129 : vector<16x128xf32>
    %cst_44 = arith.constant dense<0.000000e+00> : vector<16xf32>
    %131 = vector.multi_reduction <add>, %130, %cst_44 [1] : vector<16x128xf32> to vector<16xf32>
    %132 = vector.shape_cast %131 : vector<16xf32> to vector<16x1xf32>
    %133 = tpu.reciprocal %132 {approx = true} : vector<16x1xf32> -> vector<16x1xf32>
    %134 = vector.broadcast %133 : vector<16x1xf32> to vector<16x128xf32>
    %135 = arith.mulf %130, %134 : vector<16x128xf32>
    %cst_45 = arith.constant 1.000000e-03 : f32
    %136 = vector.broadcast %cst_45 : f32 to vector<16x128xf32>
    %137 = arith.maximumf %135, %136 : vector<16x128xf32>
    %138 = vector.broadcast %54 : vector<1x128xf32> to vector<16x128xf32>
    %139 = arith.mulf %137, %138 : vector<16x128xf32>
    %cst_46 = arith.constant dense<0.000000e+00> : vector<16xf32>
    %140 = vector.multi_reduction <add>, %139, %cst_46 [1] : vector<16x128xf32> to vector<16xf32>
    %141 = vector.shape_cast %140 : vector<16xf32> to vector<16x1xf32>
    %142 = arith.addf %42, %53 : vector<16x128xf32>
    %cst_47 = arith.constant -1.000000e+30 : f32
    %143 = vector.shape_cast %57 : vector<1x128xi1> to vector<1x128xi1>
    %144 = vector.broadcast %143 : vector<1x128xi1> to vector<16x128xi1>
    %145 = vector.broadcast %cst_47 : f32 to vector<16x128xf32>
    %146 = arith.select %144, %142, %145 : vector<16x128xi1>, vector<16x128xf32>
    %cst_48 = arith.constant dense<0xFF800000> : vector<16xf32>
    %147 = vector.multi_reduction <maximumf>, %146, %cst_48 [1] : vector<16x128xf32> to vector<16xf32>
    %148 = vector.shape_cast %147 : vector<16xf32> to vector<16x1xf32>
    %149 = vector.broadcast %148 : vector<16x1xf32> to vector<16x128xf32>
    %150 = arith.subf %146, %149 : vector<16x128xf32>
    %151 = math.exp %150 : vector<16x128xf32>
    %cst_49 = arith.constant dense<0.000000e+00> : vector<16xf32>
    %152 = vector.multi_reduction <add>, %151, %cst_49 [1] : vector<16x128xf32> to vector<16xf32>
    %153 = vector.shape_cast %152 : vector<16xf32> to vector<16x1xf32>
    %154 = tpu.reciprocal %153 {approx = true} : vector<16x1xf32> -> vector<16x1xf32>
    %155 = vector.broadcast %154 : vector<16x1xf32> to vector<16x128xf32>
    %156 = arith.mulf %151, %155 : vector<16x128xf32>
    %cst_50 = arith.constant 1.000000e-03 : f32
    %157 = vector.broadcast %cst_50 : f32 to vector<16x128xf32>
    %158 = arith.maximumf %156, %157 : vector<16x128xf32>
    %159 = vector.broadcast %54 : vector<1x128xf32> to vector<16x128xf32>
    %160 = arith.mulf %158, %159 : vector<16x128xf32>
    %cst_51 = arith.constant dense<0.000000e+00> : vector<16xf32>
    %161 = vector.multi_reduction <add>, %160, %cst_51 [1] : vector<16x128xf32> to vector<16xf32>
    %162 = vector.shape_cast %161 : vector<16xf32> to vector<16x1xf32>
    %163 = arith.addf %43, %53 : vector<16x128xf32>
    %cst_52 = arith.constant -1.000000e+30 : f32
    %164 = vector.shape_cast %57 : vector<1x128xi1> to vector<1x128xi1>
    %165 = vector.broadcast %164 : vector<1x128xi1> to vector<16x128xi1>
    %166 = vector.broadcast %cst_52 : f32 to vector<16x128xf32>
    %167 = arith.select %165, %163, %166 : vector<16x128xi1>, vector<16x128xf32>
    %cst_53 = arith.constant dense<0xFF800000> : vector<16xf32>
    %168 = vector.multi_reduction <maximumf>, %167, %cst_53 [1] : vector<16x128xf32> to vector<16xf32>
    %169 = vector.shape_cast %168 : vector<16xf32> to vector<16x1xf32>
    %170 = vector.broadcast %169 : vector<16x1xf32> to vector<16x128xf32>
    %171 = arith.subf %167, %170 : vector<16x128xf32>
    %172 = math.exp %171 : vector<16x128xf32>
    %cst_54 = arith.constant dense<0.000000e+00> : vector<16xf32>
    %173 = vector.multi_reduction <add>, %172, %cst_54 [1] : vector<16x128xf32> to vector<16xf32>
    %174 = vector.shape_cast %173 : vector<16xf32> to vector<16x1xf32>
    %175 = tpu.reciprocal %174 {approx = true} : vector<16x1xf32> -> vector<16x1xf32>
    %176 = vector.broadcast %175 : vector<16x1xf32> to vector<16x128xf32>
    %177 = arith.mulf %172, %176 : vector<16x128xf32>
    %cst_55 = arith.constant 1.000000e-03 : f32
    %178 = vector.broadcast %cst_55 : f32 to vector<16x128xf32>
    %179 = arith.maximumf %177, %178 : vector<16x128xf32>
    %180 = vector.broadcast %54 : vector<1x128xf32> to vector<16x128xf32>
    %181 = arith.mulf %179, %180 : vector<16x128xf32>
    %cst_56 = arith.constant dense<0.000000e+00> : vector<16xf32>
    %182 = vector.multi_reduction <add>, %181, %cst_56 [1] : vector<16x128xf32> to vector<16xf32>
    %183 = vector.shape_cast %182 : vector<16xf32> to vector<16x1xf32>
    %184 = tpu.concatenate %78, %99, %120, %141, %162, %183 in 1 : vector<16x1xf32>, vector<16x1xf32>, vector<16x1xf32>, vector<16x1xf32>, vector<16x1xf32>, vector<16x1xf32> -> vector<16x6xf32>
    %c0_57 = arith.constant 0 : index
    %c0_58 = arith.constant 0 : index
    %185 = vector.load %arg4[%c0_57, %c0_58] : memref<16x6xf32, #tpu.memory_space<vmem>>, vector<16x6xf32>
    tpu.vector_store %arg4[%c0_57, %c0_58], %184 {strides = array<i32>} : memref<16x6xf32, #tpu.memory_space<vmem>>, vector<16x6xf32>,
    return
  }
  func.func @transform_0(%arg0: i32) -> (i32, i32) {
    %c0_i32 = arith.constant 0 : i32
    %c0_i32_0 = arith.constant 0 : i32
    return %arg0, %c0_i32 : i32, i32
  }
  func.func @transform_1(%arg0: i32) -> (i32, i32) {
    %c0_i32 = arith.constant 0 : i32
    %c0_i32_0 = arith.constant 0 : i32
    %c0_i32_1 = arith.constant 0 : i32
    return %c0_i32, %c0_i32_0 : i32, i32
  }
  func.func @transform_2(%arg0: i32) -> (i32, i32) {
    %c0_i32 = arith.constant 0 : i32
    %c0_i32_0 = arith.constant 0 : i32
    %c0_i32_1 = arith.constant 0 : i32
    return %c0_i32, %c0_i32_0 : i32, i32
  }
  func.func @transform_3(%arg0: i32) -> (i32, i32) {
    %c0_i32 = arith.constant 0 : i32
    %c0_i32_0 = arith.constant 0 : i32
    return %arg0, %c0_i32 : i32, i32
  }
}

</mosaic_0001>

<bundles_post_ra>
// kernel: tpu_custom_call.1
= control target key start
LH: loop header
LB: loop body
LE: loop exit
PB: predicated region body
PF: predicated region fallthrough
CT: control target
= control target key end

     0   :  { %8 = vsyncpa [#allocation3], 0  ;;  %s2941_s0 = inlined_call_operand.hbm [shape: bf16[16,64], index: 0, kind: input, shape index: {}]   ;;  %s2942_s1 = inlined_call_operand.hbm [shape: bf16[256,1920], index: 1, kind: input, shape index: {}]   ;;  %s2943_s2 = inlined_call_operand.hbm [shape: f32[1,2048], index: 2, kind: input, shape index: {}]   ;;  %s2944_s3 = inlined_call_operand.vmem [shape: f32[16,6], index: 3, kind: output, shape index: {}]  }
   0x1   :  { %9 = vsyncpa [#allocation5], 0  ;;  %s2761_s12 = smov [#allocation4]   ;;  %s2691_s16 = scalar_lea.hbm %s2942_s1, 30720 }
   0x2   :  { %s27_s13 = sshll.u32 %s2761_s12, 4  ;;  %p2692_p0 = scmp.ne.s32.totalorder %s2942_s1, %s2691_s16  ;;  %s28_s13 = int_to_ptr.vmem [resolvable:$true] %s27_s13 }
   0x3   :  { %p2695_p1 = scmp.lt.u32.totalorder %s2691_s16, %s2942_s1 }
   0x5   :  { %p2697_p2 = pnand %p2695_p1, %p2692_p0 }
   0x7   :  { %2700 = shalt.err (!%p2697_p2)
}
   0x8   :  { %s2701_s21 = scalar_lea.vmem %s28_s13, 30720  ;;  %p2706_p4 = scmp.lt.s32.totalorder %s28_s13, %s28_s13 }
   0x9   :  { %p2702_p3 = scmp.ne.s32.totalorder %s28_s13, %s2701_s21  ;;  %p2707_p5 = scmp.lt.s32.totalorder %s2701_s21, %s2701_s21 }
   0xb   :  { %p2708_p6 = por %p2707_p5, %p2706_p4 }
   0xd   :  { %p2709_p7 = pnand %p2708_p6, %p2702_p3 }
   0xf   :  { %2712 = shalt.err (!%p2709_p7)
}
  0x10   :  { %s2762_s22 = smov 960   ;;  %s2763_s23 = smov 60  }
  0x11   :  { %33 = dma.hbm_to_vmem [thread:$0]  %s2942_s1, 30720, %s28_s13, [#allocation5], %s2762_s22, %s2762_s22, %s2763_s23  }
  0x12   :  { %s2764_s26 = smov [#allocation2]   ;;  %s2713_s30 = scalar_lea.hbm %s2941_s0, 128 }
  0x13   :  { %s15_s27 = sshll.u32 %s2764_s26, 4  ;;  %p2714_p8 = scmp.ne.s32.totalorder %s2941_s0, %s2713_s30  ;;  %s16_s27 = int_to_ptr.vmem [resolvable:$true] %s15_s27 }
  0x14   :  { %p2717_p9 = scmp.lt.u32.totalorder %s2713_s30, %s2941_s0 }
  0x16   :  { %p2719_p10 = pnand %p2717_p9, %p2714_p8 }
  0x18   :  { %2722 = shalt.err (!%p2719_p10)
}
  0x19   :  { %s2723_s8 = scalar_lea.vmem %s16_s27, 128  ;;  %p2728_p12 = scmp.lt.s32.totalorder %s16_s27, %s16_s27 }
  0x1a   :  { %p2724_p11 = scmp.ne.s32.totalorder %s16_s27, %s2723_s8  ;;  %p2729_p13 = scmp.lt.s32.totalorder %s2723_s8, %s2723_s8 }
  0x1c   :  { %p2730_p0 = por %p2729_p13, %p2728_p12 }
  0x1e   :  { %p2731_p1 = pnand %p2730_p0, %p2724_p11 }
  0x20   :  { %2734 = shalt.err (!%p2731_p1)
}
  0x21   :  { %s2765_s1 = smov 64   ;;  %s2766_s9 = smov 4  }
  0x22   :  { %21 = dma.hbm_to_vmem [thread:$0]  %s2941_s0, 128, %s16_s27, [#allocation3], %s2765_s1, %s2765_s1, %s2766_s9  }
  0x23   :  { %s2767_s12 = smov [#allocation6]   ;;  %s2735_s16 = scalar_lea.hbm %s2943_s2, 256 }
  0x24   :  { %s40_s13 = sshll.u32 %s2767_s12, 4  ;;  %p2736_p2 = scmp.ne.s32.totalorder %s2943_s2, %s2735_s16  ;;  %s41_s13 = int_to_ptr.vmem [resolvable:$true] %s40_s13 }
  0x25   :  { %p2739_p3 = scmp.lt.u32.totalorder %s2735_s16, %s2943_s2 }
  0x27   :  { %p2741_p4 = pnand %p2739_p3, %p2736_p2 }
  0x29   :  { %2744 = shalt.err (!%p2741_p4)
}
  0x2a   :  { %s2745_s21 = scalar_lea.vmem %s41_s13, 256  ;;  %p2750_p6 = scmp.lt.s32.totalorder %s41_s13, %s41_s13 }
  0x2b   :  { %p2746_p5 = scmp.ne.s32.totalorder %s41_s13, %s2745_s21  ;;  %p2751_p7 = scmp.lt.s32.totalorder %s2745_s21, %s2745_s21 }
  0x2d   :  { %p2752_p8 = por %p2751_p7, %p2750_p6 }
  0x2f   :  { %p2753_p9 = pnand %p2752_p8, %p2746_p5 }
  0x31   :  { %2756 = shalt.err (!%p2753_p9)
}
  0x32   :  { %43 = dma.hbm_to_vmem [thread:$0]  %s2943_s2, 256, %s41_s13, [#allocation5]  }
  0x33   :  { %2757 = dma.done.wait [#allocation3], 128  }
  0x34   :  { %2758 = vsyncadd [#allocation3], 4294967168 }
  0x35   :  { %2759 = dma.done.wait [#allocation5], 30976  }
  0x36   :  { %2760 = vsyncadd [#allocation5], 4294936320  ;;  %v2768_v0 = vmov 0   ;;  %v2326_v1 = vld [vmem:[#allocation4 + $0x4] ss:$60 sps:$4 sm:$0xff]   ;;  %v2338_v14 = vld [vmem:[#allocation2] sm:$0xff]  }
  0x37   :  { %157 = vmatprep.mubr.bf16.mxu0 %v2768_v0  ;;  %v2328_v2 = vld [vmem:[#allocation4] ss:$60 sps:$4 sm:$0xff]   ;;  %125 = vmatprep.subr.bf16.mxu0 %v2326_v1  ;;  %v2331_v4 = vld [vmem:[#allocation4 + $0x78] ss:$60 sps:$4 sm:$0xff]   ;;  %v2334_v6 = vld [vmem:[#allocation4 + $0xf0] ss:$60 sps:$4 sm:$0xff]  }
  0x38   :  { %v2329_v3 = vld [vmem:[#allocation4 + $0x7c] ss:$60 sps:$4 sm:$0xff]   ;;  %126 = vmatpush1.bf16.msra.mxu0 %v2328_v2  ;;  %v2332_v5 = vld [vmem:[#allocation4 + $0xf4] ss:$60 sps:$4 sm:$0xff]   ;;  %v2339_v7 = vld [vmem:[#allocation4 + $0xc] ss:$60 sps:$4 sm:$0xff]  }
  0x39   :  { %127 = vmatprep.subr.bf16.mxu0 %v2329_v3  ;;  %v2341_v8 = vld [vmem:[#allocation4 + $0x8] ss:$60 sps:$4 sm:$0xff]   ;;  %378 = vmatprep.subr.bf16.mxu1 %v2339_v7  ;;  %v2344_v11 = vld [vmem:[#allocation4 + $0x80] ss:$60 sps:$4 sm:$0xff]   ;;  %v2347_v15 = vld [vmem:[#allocation4 + $0xf8] ss:$60 sps:$4 sm:$0xff]   ;;  %v66_v7 = vlaneseq }
  0x3a   :  { %v2335_v9 = vld [vmem:[#allocation4 + $0x16c] ss:$60 sps:$4 sm:$0xff]   ;;  %v2342_v10 = vld [vmem:[#allocation4 + $0x84] ss:$60 sps:$4 sm:$0xff]   ;;  %379 = vmatpush1.bf16.msra.mxu1 %v2341_v8  ;;  %v2345_v13 = vld [vmem:[#allocation4 + $0xfc] ss:$60 sps:$4 sm:$0xff]  }
  0x3b   :  { %v2337_v12 = vld [vmem:[#allocation4 + $0x168] ss:$60 sps:$4 sm:$0xff]   ;;  %380 = vmatprep.subr.bf16.mxu1 %v2342_v10  ;;  %vm121_vm0 = vcmask 523264   ;;  %v2348_v16 = vld [vmem:[#allocation4 + $0x174] ss:$60 sps:$4 sm:$0xff]   ;;  %v2826_v8 = vshrl.u32 %v66_v7, 7 }
  0x3c   :  { %128 = vmatpush1.bf16.msra.mxu0 %v2331_v4  ;;  %v2350_v17 = vld [vmem:[#allocation4 + $0x170] ss:$60 sps:$4 sm:$0xff]   ;;  %v2353_v19 = vld [vmem:[#allocation4 + $0x1e8] ss:$60 sps:$4 sm:$0xff]   ;;  %v2356_v21 = vld [vmem:[#allocation4 + $0x260] ss:$60 sps:$4 sm:$0xff]  }
  0x3d   :  { %129 = vmatprep.subr.bf16.mxu0 %v2332_v5  ;;  %v2351_v18 = vld [vmem:[#allocation4 + $0x1ec] ss:$60 sps:$4 sm:$0xff]   ;;  %v2354_v20 = vld [vmem:[#allocation4 + $0x264] ss:$60 sps:$4 sm:$0xff]   ;;  %v2357_v22 = vld [vmem:[#allocation4 + $0x2dc] ss:$60 sps:$4 sm:$0xff]  }
  0x3e   :  { %381 = vmatpush1.bf16.msra.mxu1 %v2344_v11  ;;  %v2359_v23 = vld [vmem:[#allocation4 + $0x2d8] ss:$60 sps:$4 sm:$0xff]   ;;  %v2362_v25 = vld [vmem:[#allocation4 + $0x350] ss:$60 sps:$4 sm:$0xff]   ;;  %v2365_v27 = vld [vmem:[#allocation4 + $0x3c8] ss:$60 sps:$4 sm:$0xff]  }
  0x3f   :  { %382 = vmatprep.subr.bf16.mxu1 %v2345_v13  ;;  %v2360_v24 = vld [vmem:[#allocation4 + $0x354] ss:$60 sps:$4 sm:$0xff]   ;;  %v2363_v26 = vld [vmem:[#allocation4 + $0x3cc] ss:$60 sps:$4 sm:$0xff]   ;;  %v2366_v28 = vld [vmem:[#allocation4 + $0x444] ss:$60 sps:$4 sm:$0xff]  }
  0x40   :  { %130 = vmatpush1.bf16.msra.mxu0 %v2334_v6  ;;  %v2368_v29 = vld [vmem:[#allocation4 + $0x440] ss:$60 sps:$4 sm:$0xff]   ;;  %v2371_v31 = vld [vmem:[#allocation4 + $0x4b8] ss:$60 sps:$4 sm:$0xff]   ;;  %v2374_v33 = vld [vmem:[#allocation4 + $0x530] ss:$60 sps:$4 sm:$0xff]  }
  0x41   :  { %131 = vmatprep.subr.bf16.mxu0 %v2335_v9  ;;  %v2369_v30 = vld [vmem:[#allocation4 + $0x4bc] ss:$60 sps:$4 sm:$0xff]   ;;  %v2372_v32 = vld [vmem:[#allocation4 + $0x534] ss:$60 sps:$4 sm:$0xff]   ;;  %v2375_v34 = vld [vmem:[#allocation4 + $0x5ac] ss:$60 sps:$4 sm:$0xff]  }
  0x42   :  { %383 = vmatpush1.bf16.msra.mxu1 %v2347_v15  ;;  %v2377_v35 = vld [vmem:[#allocation4 + $0x5a8] ss:$60 sps:$4 sm:$0xff]   ;;  %v2380_v37 = vld [vmem:[#allocation4 + $0x620] ss:$60 sps:$4 sm:$0xff]   ;;  %v2383_v39 = vld [vmem:[#allocation4 + $0x698] ss:$60 sps:$4 sm:$0xff]  }
  0x43   :  { %384 = vmatprep.subr.bf16.mxu1 %v2348_v16  ;;  %v2378_v36 = vld [vmem:[#allocation4 + $0x624] ss:$60 sps:$4 sm:$0xff]   ;;  %v2381_v38 = vld [vmem:[#allocation4 + $0x69c] ss:$60 sps:$4 sm:$0xff]   ;;  %v2384_v40 = vld [vmem:[#allocation4 + $0x714] ss:$60 sps:$4 sm:$0xff]  }
  0x44   :  { %132 = vmatpush1.bf16.msra.mxu0 %v2337_v12  ;;  %v2386_v41 = vld [vmem:[#allocation4 + $0x710] ss:$60 sps:$4 sm:$0xff]   ;;  %v2392_v44 = vld [vmem:[#allocation4 + $0x1c] ss:$60 sps:$4 sm:$0xff]   ;;  %v2393_v46 = vld [vmem:[#allocation4 + $0x88] ss:$60 sps:$4 sm:$0xff]  }
  0x45   :  { %v2387_v42 = vld [vmem:[#allocation4 + $0x10] ss:$60 sps:$4 sm:$0xff]   ;;  %v2401_v47 = vld [vmem:[#allocation4 + $0x104] ss:$60 sps:$4 sm:$0xff]   ;;  %v2407_v49 = vld [vmem:[#allocation4 + $0x17c] ss:$60 sps:$4 sm:$0xff]  }
  0x46   :  { %385 = vmatpush1.bf16.msra.mxu1 %v2350_v17  ;;  %v2389_v43 = vld [vmem:[#allocation4 + $0x14] ss:$60 sps:$4 sm:$0xff]   ;;  %v2395_v45 = vld [vmem:[#allocation4 + $0x8c] ss:$60 sps:$4 sm:$0xff]   ;;  %v2399_v48 = vld [vmem:[#allocation4 + $0x100] ss:$60 sps:$4 sm:$0xff]  }
  0x47   :  { %2085 = vmatmul.mubr.msk.bf16.vlgmr.msra.gmra.mrb[0].mxu0 %vm121_vm0, %v2338_v14  ;;  %386 = vmatprep.subr.bf16.mxu1 %v2351_v18  ;;  %v2405_v50 = vld [vmem:[#allocation4 + $0x178] ss:$60 sps:$4 sm:$0xff]   ;;  %v2411_v52 = vld [vmem:[#allocation4 + $0x1f0] ss:$60 sps:$4 sm:$0xff]   ;;  %v2417_v54 = vld [vmem:[#allocation4 + $0x268] ss:$60 sps:$4 sm:$0xff]  }
  0x48   :  { %833 = vmatprep.subr.bf16.mxu0 %v2389_v43  ;;  %v2413_v51 = vld [vmem:[#allocation4 + $0x1f4] ss:$60 sps:$4 sm:$0xff]   ;;  %v2419_v53 = vld [vmem:[#allocation4 + $0x26c] ss:$60 sps:$4 sm:$0xff]   ;;  %v2425_v55 = vld [vmem:[#allocation4 + $0x2e4] ss:$60 sps:$4 sm:$0xff]  }
  0x49   :  { %834 = vmatpush1.bf16.msra.mxu0 %v2387_v42  ;;  %v2423_v56 = vld [vmem:[#allocation4 + $0x2e0] ss:$60 sps:$4 sm:$0xff]   ;;  %v2429_v58 = vld [vmem:[#allocation4 + $0x358] ss:$60 sps:$4 sm:$0xff]   ;;  %v2435_v60 = vld [vmem:[#allocation4 + $0x3d0] ss:$60 sps:$4 sm:$0xff]  }
  0x4a   :  { %387 = vmatpush1.bf16.msra.mxu1 %v2353_v19  ;;  %835 = vmatprep.subr.bf16.mxu0 %v2395_v45  ;;  %v2431_v57 = vld [vmem:[#allocation4 + $0x35c] ss:$60 sps:$4 sm:$0xff]   ;;  %v2437_v59 = vld [vmem:[#allocation4 + $0x3d4] ss:$60 sps:$4 sm:$0xff]   ;;  %v2443_v61 = vld [vmem:[#allocation4 + $0x44c] ss:$60 sps:$4 sm:$0xff]  }
  0x4b   :  { %388 = vmatprep.subr.bf16.mxu1 %v2354_v20  ;;  %v2441_v62 = vld [vmem:[#allocation4 + $0x448] ss:$60 sps:$4 sm:$0xff]   ;;  %v2447_v0 = vld [vmem:[#allocation4 + $0x4c0] ss:$60 sps:$4 sm:$0xff]   ;;  %v2453_v2 = vld [vmem:[#allocation4 + $0x538] ss:$60 sps:$4 sm:$0xff]  }
  0x4c   :  { %v2449_v63 = vld [vmem:[#allocation4 + $0x4c4] ss:$60 sps:$4 sm:$0xff]   ;;  %v2455_v1 = vld [vmem:[#allocation4 + $0x53c] ss:$60 sps:$4 sm:$0xff]   ;;  %v2461_v3 = vld [vmem:[#allocation4 + $0x5b4] ss:$60 sps:$4 sm:$0xff]  }
  0x4d   :  { %836 = vmatpush1.bf16.msra.mxu0 %v2393_v46  ;;  %v2459_v4 = vld [vmem:[#allocation4 + $0x5b0] ss:$60 sps:$4 sm:$0xff]   ;;  %v2465_v6 = vld [vmem:[#allocation4 + $0x628] ss:$60 sps:$4 sm:$0xff]   ;;  %v2829_v9 = vsub.s32 0, %v2826_v8  ;;  %v2832_v11 = vsub.s32 1, %v2826_v8 }
  0x4e   :  { %389 = vmatpush1.bf16.msra.mxu1 %v2356_v21  ;;  %837 = vmatprep.subr.bf16.mxu0 %v2401_v47  ;;  %v2467_v5 = vld [vmem:[#allocation4 + $0x62c] ss:$60 sps:$4 sm:$0xff]   ;;  %v64_v10 = vld [vmem:[#allocation6] sm:$0x3]  ;;  %v2440_v43 = vld [vmem:[#allocation4 + $0x3dc] ss:$60 sps:$4 sm:$0xff]  }
  0x4f   :  { %390 = vmatprep.subr.bf16.mxu1 %v2357_v22  ;;  %v69_v12 = vrot.slane %v64_v10, %v2829_v9  ;;  %v73_v13 = vrot.slane %v64_v10, %v2832_v11  ;;  %v2432_v42 = vld [vmem:[#allocation4 + $0x360] ss:$60 sps:$4 sm:$0xff]   ;;  %v2446_v45 = vld [vmem:[#allocation4 + $0x454] ss:$60 sps:$4 sm:$0xff]   ;;  %v2452_v47 = vld [vmem:[#allocation4 + $0x4cc] ss:$60 sps:$4 sm:$0xff]  }
  0x50   :  { %v2444_v46 = vld [vmem:[#allocation4 + $0x450] ss:$60 sps:$4 sm:$0xff]   ;;  %vm2052_vm2 = vcmask 7168   ;;  %vm2055_vm3 = vcmask 15360   ;;  %vm2058_vm4 = vcmask 23552   ;;  %vm2061_vm5 = vcmask 31744  }
  0x51   :  { %838 = vmatpush1.bf16.msra.mxu0 %v2399_v48  ;;  %v2450_v48 = vld [vmem:[#allocation4 + $0x4c8] ss:$60 sps:$4 sm:$0xff]   ;;  %vm2064_vm6 = vcmask 39936   ;;  %vm2067_vm7 = vcmask 48128  }
  0x52   :  { %391 = vmatpush1.bf16.msra.mxu1 %v2359_v23  ;;  %839 = vmatprep.subr.bf16.mxu0 %v2407_v49  ;;  %v2458_v49 = vld [vmem:[#allocation4 + $0x544] ss:$60 sps:$4 sm:$0xff]  }
  0x53   :  { %392 = vmatprep.subr.bf16.mxu1 %v2360_v24 }
  0x55   :  { %840 = vmatpush1.bf16.msra.mxu0 %v2405_v50  ;;  %v2456_v50 = vld [vmem:[#allocation4 + $0x540] ss:$60 sps:$4 sm:$0xff]  }
  0x56   :  { %393 = vmatpush1.bf16.msra.mxu1 %v2362_v25  ;;  %841 = vmatprep.subr.bf16.mxu0 %v2413_v51  ;;  %v2464_v51 = vld [vmem:[#allocation4 + $0x5bc] ss:$60 sps:$4 sm:$0xff]  }
  0x57   :  { %394 = vmatprep.subr.bf16.mxu1 %v2363_v26 }
  0x59   :  { %842 = vmatpush1.bf16.msra.mxu0 %v2411_v52  ;;  %v2462_v52 = vld [vmem:[#allocation4 + $0x5b8] ss:$60 sps:$4 sm:$0xff]  }
  0x5a   :  { %395 = vmatpush1.bf16.msra.mxu1 %v2365_v27  ;;  %843 = vmatprep.subr.bf16.mxu0 %v2419_v53  ;;  %v2470_v53 = vld [vmem:[#allocation4 + $0x634] ss:$60 sps:$4 sm:$0xff]  }
  0x5b   :  { %396 = vmatprep.subr.bf16.mxu1 %v2366_v28  ;;  %v2390_v28 = vld [vmem:[#allocation4 + $0x18] ss:$60 sps:$4 sm:$0xff]  }
  0x5d   :  { %844 = vmatpush1.bf16.msra.mxu0 %v2417_v54  ;;  %v2468_v54 = vld [vmem:[#allocation4 + $0x630] ss:$60 sps:$4 sm:$0xff]  }
  0x5e   :  { %397 = vmatpush1.bf16.msra.mxu1 %v2368_v29  ;;  %845 = vmatprep.subr.bf16.mxu0 %v2425_v55  ;;  %v2398_v29 = vld [vmem:[#allocation4 + $0x94] ss:$60 sps:$4 sm:$0xff]   ;;  %v2473_v55 = vld [vmem:[#allocation4 + $0x6a4] ss:$60 sps:$4 sm:$0xff]  }
  0x5f   :  { %398 = vmatprep.subr.bf16.mxu1 %v2369_v30  ;;  %v2396_v30 = vld [vmem:[#allocation4 + $0x90] ss:$60 sps:$4 sm:$0xff]  }
  0x61   :  { %846 = vmatpush1.bf16.msra.mxu0 %v2423_v56  ;;  %v2476_v56 = vld [vmem:[#allocation4 + $0x6ac] ss:$60 sps:$4 sm:$0xff]  }
  0x62   :  { %399 = vmatpush1.bf16.msra.mxu1 %v2371_v31  ;;  %847 = vmatprep.subr.bf16.mxu0 %v2431_v57  ;;  %v2404_v31 = vld [vmem:[#allocation4 + $0x10c] ss:$60 sps:$4 sm:$0xff]   ;;  %v2471_v57 = vld [vmem:[#allocation4 + $0x6a0] ss:$60 sps:$4 sm:$0xff]  }
  0x63   :  { %400 = vmatprep.subr.bf16.mxu1 %v2372_v32  ;;  %v2402_v32 = vld [vmem:[#allocation4 + $0x108] ss:$60 sps:$4 sm:$0xff]  }
  0x65   :  { %848 = vmatpush1.bf16.msra.mxu0 %v2429_v58  ;;  %v2474_v58 = vld [vmem:[#allocation4 + $0x6a8] ss:$60 sps:$4 sm:$0xff]  }
  0x66   :  { %401 = vmatpush1.bf16.msra.mxu1 %v2374_v33  ;;  %849 = vmatprep.subr.bf16.mxu0 %v2437_v59  ;;  %v2410_v33 = vld [vmem:[#allocation4 + $0x184] ss:$60 sps:$4 sm:$0xff]   ;;  %v2479_v59 = vld [vmem:[#allocation4 + $0x71c] ss:$60 sps:$4 sm:$0xff]  }
  0x67   :  { %402 = vmatprep.subr.bf16.mxu1 %v2375_v34  ;;  %v2408_v34 = vld [vmem:[#allocation4 + $0x180] ss:$60 sps:$4 sm:$0xff]  }
  0x69   :  { %850 = vmatpush1.bf16.msra.mxu0 %v2435_v60  ;;  %v2482_v60 = vld [vmem:[#allocation4 + $0x724] ss:$60 sps:$4 sm:$0xff]  }
  0x6a   :  { %403 = vmatpush1.bf16.msra.mxu1 %v2377_v35  ;;  %851 = vmatprep.subr.bf16.mxu0 %v2443_v61  ;;  %v2416_v35 = vld [vmem:[#allocation4 + $0x1fc] ss:$60 sps:$4 sm:$0xff]  }
  0x6b   :  { %404 = vmatprep.subr.bf16.mxu1 %v2378_v36  ;;  %v2414_v36 = vld [vmem:[#allocation4 + $0x1f8] ss:$60 sps:$4 sm:$0xff]  }
  0x6c   :  { %v2477_v61 = vld [vmem:[#allocation4 + $0x718] ss:$60 sps:$4 sm:$0xff]  }
  0x6d   :  { %852 = vmatpush1.bf16.msra.mxu0 %v2441_v62  ;;  %v2480_v62 = vld [vmem:[#allocation4 + $0x720] ss:$60 sps:$4 sm:$0xff]  }
  0x6e   :  { %405 = vmatpush1.bf16.msra.mxu1 %v2380_v37  ;;  %853 = vmatprep.subr.bf16.mxu0 %v2449_v63  ;;  %v2422_v37 = vld [vmem:[#allocation4 + $0x274] ss:$60 sps:$4 sm:$0xff]   ;;  %v2485_v63 = vld [vmem:[#allocation4 + $0x24] ss:$60 sps:$4 sm:$0xff]  }
  0x6f   :  { %406 = vmatprep.subr.bf16.mxu1 %v2381_v38  ;;  %v2420_v38 = vld [vmem:[#allocation4 + $0x270] ss:$60 sps:$4 sm:$0xff]  }
  0x71   :  { %854 = vmatpush1.bf16.msra.mxu0 %v2447_v0  ;;  %v2488_v0 = vld [vmem:[#allocation4 + $0x2c] ss:$60 sps:$4 sm:$0xff]  }
  0x72   :  { %407 = vmatpush1.bf16.msra.mxu1 %v2383_v39  ;;  %855 = vmatprep.subr.bf16.mxu0 %v2455_v1  ;;  %v2428_v39 = vld [vmem:[#allocation4 + $0x2ec] ss:$60 sps:$4 sm:$0xff]   ;;  %v204_v1 = vld [vmem:[#allocation6 + $0x2] sm:$0x3] }
  0x73   :  { %408 = vmatprep.subr.bf16.mxu1 %v2384_v40  ;;  %v2426_v40 = vld [vmem:[#allocation4 + $0x2e8] ss:$60 sps:$4 sm:$0xff]  }
  0x75   :  { %856 = vmatpush1.bf16.msra.mxu0 %v2453_v2  ;;  %v211_v2 = vrot.slane %v204_v1, %v2829_v9 }
  0x76   :  { %409 = vmatpush1.bf16.msra.mxu1 %v2386_v41  ;;  %857 = vmatprep.subr.bf16.mxu0 %v2461_v3  ;;  %v2434_v41 = vld [vmem:[#allocation4 + $0x364] ss:$60 sps:$4 sm:$0xff]   ;;  %v215_v3 = vrot.slane %v204_v1, %v2832_v11  ;;  %v2554_v1 = vld [vmem:[#allocation4 + $0x554] ss:$60 sps:$4 sm:$0xff]  }
  0x77   :  { %876 = vmatprep.subr.bf16.mxu1 %v2392_v44  ;;  %v2438_v44 = vld [vmem:[#allocation4 + $0x3d8] ss:$60 sps:$4 sm:$0xff]  }
  0x79   :  { %858 = vmatpush1.bf16.msra.mxu0 %v2459_v4 }
  0x7a   :  { %859 = vmatprep.subr.bf16.mxu0 %v2467_v5 }
  0x7d   :  { %860 = vmatpush1.bf16.msra.mxu0 %v2465_v6 }
  0x7e   :  { %861 = vmatprep.subr.bf16.mxu0 %v2473_v55  ;;  %v2534_v55 = vld [vmem:[#allocation4 + $0x3e8] ss:$60 sps:$4 sm:$0xff]  }
  0x81   :  { %862 = vmatpush1.bf16.msra.mxu0 %v2471_v57  ;;  %v2542_v57 = vld [vmem:[#allocation4 + $0x464] ss:$60 sps:$4 sm:$0xff]  }
  0x82   :  { %863 = vmatprep.subr.bf16.mxu0 %v2479_v59  ;;  %v2540_v59 = vld [vmem:[#allocation4 + $0x460] ss:$60 sps:$4 sm:$0xff]  }
  0x85   :  { %864 = vmatpush1.bf16.msra.mxu0 %v2477_v61  ;;  %v2548_v61 = vld [vmem:[#allocation4 + $0x4dc] ss:$60 sps:$4 sm:$0xff]  }
  0x86   :  { %1537 = vmatprep.subr.bf16.mxu0 %v2485_v63  ;;  %v2546_v63 = vld [vmem:[#allocation4 + $0x4d8] ss:$60 sps:$4 sm:$0xff]  }
 0x11a   :  { %v159_v14 = vpop.f32.mrb[0].mxu0 }
 0x11b   :  { %v160_v15 = vadd.f32 %v159_v14, %v69_v12  ;;  %v161_v16 = vpop.f32.mrb[1].mxu0 }
 0x11c   :  { %v162_v17 = vadd.f32 %v161_v16, %v73_v13  ;;  %v163_v18 = vpop.f32.mrb[2].mxu0 }
 0x11d   :  { %v164_v19 = vadd.f32 %v163_v18, %v69_v12  ;;  %v165_v20 = vpop.f32.mrb[3].mxu0  ;;  %v168_v22 = vmax.f32 %v160_v15, 0.0 }
 0x11e   :  { %v166_v21 = vadd.f32 %v165_v20, %v73_v13  ;;  %v169_v24 = vmax.f32 %v162_v17, 0.0 }
 0x11f   :  { %v170_v23 = vmax.f32 %v164_v19, 0.0 }
 0x120   :  { %v171_v25 = vmax.f32 %v166_v21, 0.0 }
 0x121   :  { %v205_v26 = vpack.c.bf16 %v170_v23, %v168_v22  ;;  %v2483_v22 = vld [vmem:[#allocation4 + $0x20] ss:$60 sps:$4 sm:$0xff]   ;;  %v2486_v23 = vld [vmem:[#allocation4 + $0x28] ss:$60 sps:$4 sm:$0xff]  }
 0x122   :  { %v206_v27 = vpack.c.bf16 %v171_v25, %v169_v24  ;;  %v2491_v24 = vld [vmem:[#allocation4 + $0x9c] ss:$60 sps:$4 sm:$0xff]   ;;  %v2494_v25 = vld [vmem:[#allocation4 + $0xa4] ss:$60 sps:$4 sm:$0xff]  }
 0x124   :  { %410 = vmatprep.mubr.bf16.mxu1 %v206_v27  ;;  %v2492_v27 = vld [vmem:[#allocation4 + $0xa0] ss:$60 sps:$4 sm:$0xff]  }
 0x125   :  { %411 = vmatmul.mubr.bf16.vlgmr.msra.gmra.mrb[0].mxu1 %v205_v26  ;;  %v2489_v26 = vld [vmem:[#allocation4 + $0x98] ss:$60 sps:$4 sm:$0xff]  }
 0x126   :  { %877 = vmatpush1.bf16.msra.mxu1 %v2390_v28  ;;  %v2497_v28 = vld [vmem:[#allocation4 + $0x114] ss:$60 sps:$4 sm:$0xff]  }
 0x127   :  { %878 = vmatprep.subr.bf16.mxu1 %v2398_v29  ;;  %v2500_v29 = vld [vmem:[#allocation4 + $0x11c] ss:$60 sps:$4 sm:$0xff]  }
 0x12a   :  { %879 = vmatpush1.bf16.msra.mxu1 %v2396_v30  ;;  %v2495_v30 = vld [vmem:[#allocation4 + $0x110] ss:$60 sps:$4 sm:$0xff]  }
 0x12b   :  { %880 = vmatprep.subr.bf16.mxu1 %v2404_v31  ;;  %v2498_v31 = vld [vmem:[#allocation4 + $0x118] ss:$60 sps:$4 sm:$0xff]  }
 0x12e   :  { %881 = vmatpush1.bf16.msra.mxu1 %v2402_v32  ;;  %v2503_v32 = vld [vmem:[#allocation4 + $0x18c] ss:$60 sps:$4 sm:$0xff]  }
 0x12f   :  { %882 = vmatprep.subr.bf16.mxu1 %v2410_v33  ;;  %v2506_v33 = vld [vmem:[#allocation4 + $0x194] ss:$60 sps:$4 sm:$0xff]  }
 0x132   :  { %883 = vmatpush1.bf16.msra.mxu1 %v2408_v34  ;;  %v2501_v34 = vld [vmem:[#allocation4 + $0x188] ss:$60 sps:$4 sm:$0xff]  }
 0x133   :  { %884 = vmatprep.subr.bf16.mxu1 %v2416_v35  ;;  %v2504_v35 = vld [vmem:[#allocation4 + $0x190] ss:$60 sps:$4 sm:$0xff]  }
 0x136   :  { %885 = vmatpush1.bf16.msra.mxu1 %v2414_v36  ;;  %v2509_v36 = vld [vmem:[#allocation4 + $0x204] ss:$60 sps:$4 sm:$0xff]  }
 0x137   :  { %886 = vmatprep.subr.bf16.mxu1 %v2422_v37  ;;  %v2512_v37 = vld [vmem:[#allocation4 + $0x20c] ss:$60 sps:$4 sm:$0xff]  }
 0x13a   :  { %887 = vmatpush1.bf16.msra.mxu1 %v2420_v38  ;;  %v2507_v38 = vld [vmem:[#allocation4 + $0x200] ss:$60 sps:$4 sm:$0xff]  }
 0x13b   :  { %888 = vmatprep.subr.bf16.mxu1 %v2428_v39  ;;  %v2510_v39 = vld [vmem:[#allocation4 + $0x208] ss:$60 sps:$4 sm:$0xff]  }
 0x13e   :  { %889 = vmatpush1.bf16.msra.mxu1 %v2426_v40  ;;  %v2515_v40 = vld [vmem:[#allocation4 + $0x27c] ss:$60 sps:$4 sm:$0xff]  }
 0x13f   :  { %890 = vmatprep.subr.bf16.mxu1 %v2434_v41  ;;  %v2518_v41 = vld [vmem:[#allocation4 + $0x284] ss:$60 sps:$4 sm:$0xff]  }
 0x142   :  { %891 = vmatpush1.bf16.msra.mxu1 %v2432_v42  ;;  %v2513_v42 = vld [vmem:[#allocation4 + $0x278] ss:$60 sps:$4 sm:$0xff]  }
 0x143   :  { %892 = vmatprep.subr.bf16.mxu1 %v2440_v43  ;;  %v2516_v43 = vld [vmem:[#allocation4 + $0x280] ss:$60 sps:$4 sm:$0xff]  }
 0x146   :  { %893 = vmatpush1.bf16.msra.mxu1 %v2438_v44  ;;  %v2521_v44 = vld [vmem:[#allocation4 + $0x2f4] ss:$60 sps:$4 sm:$0xff]  }
 0x147   :  { %894 = vmatprep.subr.bf16.mxu1 %v2446_v45  ;;  %v2524_v45 = vld [vmem:[#allocation4 + $0x2fc] ss:$60 sps:$4 sm:$0xff]  }
 0x14a   :  { %895 = vmatpush1.bf16.msra.mxu1 %v2444_v46  ;;  %v2519_v46 = vld [vmem:[#allocation4 + $0x2f0] ss:$60 sps:$4 sm:$0xff]  }
 0x14b   :  { %896 = vmatprep.subr.bf16.mxu1 %v2452_v47  ;;  %v2522_v47 = vld [vmem:[#allocation4 + $0x2f8] ss:$60 sps:$4 sm:$0xff]  }
 0x14e   :  { %897 = vmatpush1.bf16.msra.mxu1 %v2450_v48  ;;  %v2527_v48 = vld [vmem:[#allocation4 + $0x36c] ss:$60 sps:$4 sm:$0xff]  }
 0x14f   :  { %898 = vmatprep.subr.bf16.mxu1 %v2458_v49  ;;  %v2530_v49 = vld [vmem:[#allocation4 + $0x374] ss:$60 sps:$4 sm:$0xff]  }
 0x152   :  { %899 = vmatpush1.bf16.msra.mxu1 %v2456_v50  ;;  %v2525_v50 = vld [vmem:[#allocation4 + $0x368] ss:$60 sps:$4 sm:$0xff]  }
 0x153   :  { %900 = vmatprep.subr.bf16.mxu1 %v2464_v51  ;;  %v2528_v51 = vld [vmem:[#allocation4 + $0x370] ss:$60 sps:$4 sm:$0xff]  }
 0x156   :  { %901 = vmatpush1.bf16.msra.mxu1 %v2462_v52  ;;  %v2533_v52 = vld [vmem:[#allocation4 + $0x3e4] ss:$60 sps:$4 sm:$0xff]  }
 0x157   :  { %902 = vmatprep.subr.bf16.mxu1 %v2470_v53  ;;  %v2536_v53 = vld [vmem:[#allocation4 + $0x3ec] ss:$60 sps:$4 sm:$0xff]  }
 0x15a   :  { %903 = vmatpush1.bf16.msra.mxu1 %v2468_v54  ;;  %v2531_v54 = vld [vmem:[#allocation4 + $0x3e0] ss:$60 sps:$4 sm:$0xff]  }
 0x15b   :  { %904 = vmatprep.subr.bf16.mxu1 %v2476_v56  ;;  %v2539_v56 = vld [vmem:[#allocation4 + $0x45c] ss:$60 sps:$4 sm:$0xff]  }
 0x15e   :  { %905 = vmatpush1.bf16.msra.mxu1 %v2474_v58  ;;  %v2537_v58 = vld [vmem:[#allocation4 + $0x458] ss:$60 sps:$4 sm:$0xff]  }
 0x15f   :  { %906 = vmatprep.subr.bf16.mxu1 %v2482_v60  ;;  %v2545_v60 = vld [vmem:[#allocation4 + $0x4d4] ss:$60 sps:$4 sm:$0xff]  }
 0x162   :  { %907 = vmatpush1.bf16.msra.mxu1 %v2480_v62  ;;  %v2543_v62 = vld [vmem:[#allocation4 + $0x4d0] ss:$60 sps:$4 sm:$0xff]  }
 0x163   :  { %1580 = vmatprep.subr.bf16.mxu1 %v2488_v0  ;;  %v2551_v0 = vld [vmem:[#allocation4 + $0x54c] ss:$60 sps:$4 sm:$0xff]  }
 0x1f8   :  { %v412_v4 = vpop.f32.mrb[0].mxu1 }
 0x1f9   :  { %v413_v5 = vadd.f32 %v412_v4, %v211_v2  ;;  %v414_v6 = vpop.f32.mrb[1].mxu1  ;;  %v2557_v4 = vld [vmem:[#allocation4 + $0x5c4] ss:$60 sps:$4 sm:$0xff]  }
 0x1fa   :  { %v415_v10 = vadd.f32 %v414_v6, %v215_v3  ;;  %v416_v12 = vpop.f32.mrb[2].mxu1  ;;  %v2555_v6 = vld [vmem:[#allocation4 + $0x5c0] ss:$60 sps:$4 sm:$0xff]  }
 0x1fb   :  { %v417_v13 = vadd.f32 %v416_v12, %v211_v2  ;;  %v418_v14 = vpop.f32.mrb[3].mxu1  ;;  %v421_v16 = vmax.f32 %v413_v5, 0.0  ;;  %v2549_v2 = vld [vmem:[#allocation4 + $0x548] ss:$60 sps:$4 sm:$0xff]   ;;  %v2563_v12 = vld [vmem:[#allocation4 + $0x63c] ss:$60 sps:$4 sm:$0xff]  }
 0x1fc   :  { %v419_v15 = vadd.f32 %v418_v14, %v215_v3  ;;  %v422_v18 = vmax.f32 %v415_v10, 0.0  ;;  %v2552_v3 = vld [vmem:[#allocation4 + $0x550] ss:$60 sps:$4 sm:$0xff]   ;;  %v2558_v10 = vld [vmem:[#allocation4 + $0x5c8] ss:$60 sps:$4 sm:$0xff]  }
 0x1fd   :  { %v423_v17 = vmax.f32 %v417_v13, 0.0  ;;  %v2560_v5 = vld [vmem:[#allocation4 + $0x5cc] ss:$60 sps:$4 sm:$0xff]   ;;  %v2566_v13 = vld [vmem:[#allocation4 + $0x644] ss:$60 sps:$4 sm:$0xff]  }
 0x1fe   :  { %v424_v19 = vmax.f32 %v419_v15, 0.0  ;;  %v2561_v14 = vld [vmem:[#allocation4 + $0x638] ss:$60 sps:$4 sm:$0xff]   ;;  %v2564_v15 = vld [vmem:[#allocation4 + $0x640] ss:$60 sps:$4 sm:$0xff]  }
 0x1ff   :  { %v490_v20 = vpack.c.bf16 %v423_v17, %v421_v16  ;;  %v2569_v16 = vld [vmem:[#allocation4 + $0x6b4] ss:$60 sps:$4 sm:$0xff]   ;;  %v2572_v17 = vld [vmem:[#allocation4 + $0x6bc] ss:$60 sps:$4 sm:$0xff]  }
 0x200   :  { %v491_v21 = vpack.c.bf16 %v424_v19, %v422_v18  ;;  %v2567_v18 = vld [vmem:[#allocation4 + $0x6b0] ss:$60 sps:$4 sm:$0xff]   ;;  %v2570_v19 = vld [vmem:[#allocation4 + $0x6b8] ss:$60 sps:$4 sm:$0xff]  }
 0x202   :  { %865 = vmatprep.mubr.bf16.mxu0 %v491_v21  ;;  %908 = vmatprep.mubr.bf16.mxu1 %v491_v21  ;;  %v2578_v21 = vld [vmem:[#allocation4 + $0x734] ss:$60 sps:$4 sm:$0xff]  }
 0x203   :  { %866 = vmatmul.mubr.bf16.vlgmr.msra.gmra.mrb[4].mxu0 %v490_v20  ;;  %909 = vmatmul.mubr.bf16.vlgmr.msra.gmra.mrb[4].mxu1 %v490_v20  ;;  %v2575_v20 = vld [vmem:[#allocation4 + $0x72c] ss:$60 sps:$4 sm:$0xff]  }
 0x204   :  { %1538 = vmatpush1.bf16.msra.mxu0 %v2483_v22  ;;  %1581 = vmatpush1.bf16.msra.mxu1 %v2486_v23  ;;  %v2573_v22 = vld [vmem:[#allocation4 + $0x728] ss:$60 sps:$4 sm:$0xff]   ;;  %v2576_v23 = vld [vmem:[#allocation4 + $0x730] ss:$60 sps:$4 sm:$0xff]  }
 0x205   :  { %1539 = vmatprep.subr.bf16.mxu0 %v2491_v24  ;;  %1582 = vmatprep.subr.bf16.mxu1 %v2494_v25  ;;  %v2581_v24 = vld [vmem:[#allocation4 + $0x34] ss:$60 sps:$4 sm:$0xff]  }
 0x206   :  { %v2582_v25 = vld [vmem:[#allocation4 + $0x3f8] ss:$60 sps:$4 sm:$0xff]  }
 0x208   :  { %1540 = vmatpush1.bf16.msra.mxu0 %v2489_v26  ;;  %1583 = vmatpush1.bf16.msra.mxu1 %v2492_v27  ;;  %v503_v26 = vsub.s32 2, %v2826_v8  ;;  %v489_v27 = vld [vmem:[#allocation6 + $0x4] sm:$0xf] }
 0x209   :  { %1541 = vmatprep.subr.bf16.mxu0 %v2497_v28  ;;  %1584 = vmatprep.subr.bf16.mxu1 %v2500_v29  ;;  %v507_v28 = vsub.s32 3, %v2826_v8  ;;  %v496_v29 = vrot.slane %v489_v27, %v2829_v9 }
 0x20c   :  { %1542 = vmatpush1.bf16.msra.mxu0 %v2495_v30  ;;  %1585 = vmatpush1.bf16.msra.mxu1 %v2498_v31  ;;  %v504_v30 = vrot.slane %v489_v27, %v503_v26  ;;  %v500_v31 = vrot.slane %v489_v27, %v2832_v11 }
 0x20d   :  { %1543 = vmatprep.subr.bf16.mxu0 %v2503_v32  ;;  %1586 = vmatprep.subr.bf16.mxu1 %v2506_v33  ;;  %v508_v32 = vrot.slane %v489_v27, %v507_v28  ;;  %v2613_v27 = vld [vmem:[#allocation4 + $0x308] ss:$60 sps:$4 sm:$0xff]  }
 0x210   :  { %1544 = vmatpush1.bf16.msra.mxu0 %v2501_v34  ;;  %1587 = vmatpush1.bf16.msra.mxu1 %v2504_v35 }
 0x211   :  { %1545 = vmatprep.subr.bf16.mxu0 %v2509_v36  ;;  %1588 = vmatprep.subr.bf16.mxu1 %v2512_v37 }
 0x214   :  { %1546 = vmatpush1.bf16.msra.mxu0 %v2507_v38  ;;  %1589 = vmatpush1.bf16.msra.mxu1 %v2510_v39 }
 0x215   :  { %1547 = vmatprep.subr.bf16.mxu0 %v2515_v40  ;;  %1590 = vmatprep.subr.bf16.mxu1 %v2518_v41 }
 0x218   :  { %1548 = vmatpush1.bf16.msra.mxu0 %v2513_v42  ;;  %1591 = vmatpush1.bf16.msra.mxu1 %v2516_v43 }
 0x219   :  { %1549 = vmatprep.subr.bf16.mxu0 %v2521_v44  ;;  %1592 = vmatprep.subr.bf16.mxu1 %v2524_v45 }
 0x21c   :  { %1550 = vmatpush1.bf16.msra.mxu0 %v2519_v46  ;;  %1593 = vmatpush1.bf16.msra.mxu1 %v2522_v47 }
 0x21d   :  { %1551 = vmatprep.subr.bf16.mxu0 %v2527_v48  ;;  %1594 = vmatprep.subr.bf16.mxu1 %v2530_v49 }
 0x220   :  { %1552 = vmatpush1.bf16.msra.mxu0 %v2525_v50  ;;  %1595 = vmatpush1.bf16.msra.mxu1 %v2528_v51 }
 0x221   :  { %1553 = vmatprep.subr.bf16.mxu0 %v2533_v52  ;;  %1596 = vmatprep.subr.bf16.mxu1 %v2536_v53 }
 0x224   :  { %1554 = vmatpush1.bf16.msra.mxu0 %v2531_v54  ;;  %1597 = vmatpush1.bf16.msra.mxu1 %v2534_v55 }
 0x225   :  { %1555 = vmatprep.subr.bf16.mxu0 %v2539_v56  ;;  %1598 = vmatprep.subr.bf16.mxu1 %v2542_v57 }
 0x228   :  { %1556 = vmatpush1.bf16.msra.mxu0 %v2537_v58  ;;  %1599 = vmatpush1.bf16.msra.mxu1 %v2540_v59 }
 0x229   :  { %1557 = vmatprep.subr.bf16.mxu0 %v2545_v60  ;;  %1600 = vmatprep.subr.bf16.mxu1 %v2548_v61  ;;  %v2579_v61 = vld [vmem:[#allocation4 + $0x30] ss:$60 sps:$4 sm:$0xff]  }
 0x22c   :  { %1558 = vmatpush1.bf16.msra.mxu0 %v2543_v62  ;;  %1601 = vmatpush1.bf16.msra.mxu1 %v2546_v63  ;;  %v2583_v62 = vld [vmem:[#allocation4 + $0x38] ss:$60 sps:$4 sm:$0xff]   ;;  %v2586_v63 = vld [vmem:[#allocation4 + $0xac] ss:$60 sps:$4 sm:$0xff]  }
 0x22d   :  { %1559 = vmatprep.subr.bf16.mxu0 %v2551_v0  ;;  %1602 = vmatprep.subr.bf16.mxu1 %v2554_v1  ;;  %v2587_v0 = vld [vmem:[#allocation4 + $0x470] ss:$60 sps:$4 sm:$0xff]   ;;  %v2584_v1 = vld [vmem:[#allocation4 + $0xa8] ss:$60 sps:$4 sm:$0xff]  }
 0x230   :  { %1560 = vmatpush1.bf16.msra.mxu0 %v2549_v2  ;;  %1603 = vmatpush1.bf16.msra.mxu1 %v2552_v3  ;;  %v2588_v2 = vld [vmem:[#allocation4 + $0xb0] ss:$60 sps:$4 sm:$0xff]   ;;  %v2591_v3 = vld [vmem:[#allocation4 + $0x124] ss:$60 sps:$4 sm:$0xff]  }
 0x231   :  { %1561 = vmatprep.subr.bf16.mxu0 %v2557_v4  ;;  %1604 = vmatprep.subr.bf16.mxu1 %v2560_v5  ;;  %v2592_v4 = vld [vmem:[#allocation4 + $0x4e8] ss:$60 sps:$4 sm:$0xff]   ;;  %v2589_v5 = vld [vmem:[#allocation4 + $0x120] ss:$60 sps:$4 sm:$0xff]  }
 0x234   :  { %1562 = vmatpush1.bf16.msra.mxu0 %v2555_v6  ;;  %1605 = vmatpush1.bf16.msra.mxu1 %v2558_v10  ;;  %v2593_v6 = vld [vmem:[#allocation4 + $0x128] ss:$60 sps:$4 sm:$0xff]   ;;  %v2596_v10 = vld [vmem:[#allocation4 + $0x19c] ss:$60 sps:$4 sm:$0xff]  }
 0x235   :  { %1563 = vmatprep.subr.bf16.mxu0 %v2563_v12  ;;  %1606 = vmatprep.subr.bf16.mxu1 %v2566_v13  ;;  %v2597_v12 = vld [vmem:[#allocation4 + $0x560] ss:$60 sps:$4 sm:$0xff]   ;;  %v2594_v13 = vld [vmem:[#allocation4 + $0x198] ss:$60 sps:$4 sm:$0xff]  }
 0x238   :  { %1564 = vmatpush1.bf16.msra.mxu0 %v2561_v14  ;;  %1607 = vmatpush1.bf16.msra.mxu1 %v2564_v15  ;;  %v2598_v14 = vld [vmem:[#allocation4 + $0x1a0] ss:$60 sps:$4 sm:$0xff]   ;;  %v2601_v15 = vld [vmem:[#allocation4 + $0x214] ss:$60 sps:$4 sm:$0xff]  }
 0x239   :  { %1565 = vmatprep.subr.bf16.mxu0 %v2569_v16  ;;  %1608 = vmatprep.subr.bf16.mxu1 %v2572_v17  ;;  %v2602_v16 = vld [vmem:[#allocation4 + $0x5d8] ss:$60 sps:$4 sm:$0xff]   ;;  %v2599_v17 = vld [vmem:[#allocation4 + $0x210] ss:$60 sps:$4 sm:$0xff]  }
 0x23c   :  { %1566 = vmatpush1.bf16.msra.mxu0 %v2567_v18  ;;  %1609 = vmatpush1.bf16.msra.mxu1 %v2570_v19  ;;  %v2603_v18 = vld [vmem:[#allocation4 + $0x218] ss:$60 sps:$4 sm:$0xff]   ;;  %v2606_v19 = vld [vmem:[#allocation4 + $0x28c] ss:$60 sps:$4 sm:$0xff]  }
 0x23d   :  { %1567 = vmatprep.subr.bf16.mxu0 %v2575_v20  ;;  %1610 = vmatprep.subr.bf16.mxu1 %v2578_v21  ;;  %v2607_v20 = vld [vmem:[#allocation4 + $0x650] ss:$60 sps:$4 sm:$0xff]   ;;  %v2604_v21 = vld [vmem:[#allocation4 + $0x288] ss:$60 sps:$4 sm:$0xff]  }
 0x240   :  { %1568 = vmatpush1.bf16.msra.mxu0 %v2573_v22  ;;  %1611 = vmatpush1.bf16.msra.mxu1 %v2576_v23  ;;  %v2608_v22 = vld [vmem:[#allocation4 + $0x290] ss:$60 sps:$4 sm:$0xff]   ;;  %v2611_v23 = vld [vmem:[#allocation4 + $0x304] ss:$60 sps:$4 sm:$0xff]  }
 0x241   :  { %1623 = vmatprep.subr.bf16.mxu0 %v2581_v24  ;;  %2296 = vmatprep.subr.bf16.mxu1 %v2582_v25  ;;  %v2612_v24 = vld [vmem:[#allocation4 + $0x6c8] ss:$60 sps:$4 sm:$0xff]   ;;  %v2609_v25 = vld [vmem:[#allocation4 + $0x300] ss:$60 sps:$4 sm:$0xff]  }
 0x2d6   :  { %v867_v33 = vpop.f32.mrb[4].mxu0  ;;  %v910_v34 = vpop.f32.mrb[4].mxu1 }
 0x2d7   :  { %v868_v35 = vadd.f32 %v867_v33, %v496_v29  ;;  %v911_v36 = vadd.f32 %v910_v34, %v504_v30  ;;  %v869_v37 = vpop.f32.mrb[5].mxu0  ;;  %v912_v38 = vpop.f32.mrb[5].mxu1  ;;  %v2621_v33 = vld [vmem:[#allocation4 + $0x3f4] ss:$60 sps:$4 sm:$0xff]  }
 0x2d8   :  { %v870_v39 = vadd.f32 %v869_v37, %v500_v31  ;;  %v913_v40 = vadd.f32 %v912_v38, %v508_v32  ;;  %v871_v41 = vpop.f32.mrb[6].mxu0  ;;  %v914_v42 = vpop.f32.mrb[6].mxu1  ;;  %v2619_v34 = vld [vmem:[#allocation4 + $0x3f0] ss:$60 sps:$4 sm:$0xff]   ;;  %v2627_v37 = vld [vmem:[#allocation4 + $0x4e4] ss:$60 sps:$4 sm:$0xff]  }
 0x2d9   :  { %v872_v43 = vadd.f32 %v871_v41, %v496_v29  ;;  %v915_v44 = vadd.f32 %v914_v42, %v504_v30  ;;  %v873_v45 = vpop.f32.mrb[7].mxu0  ;;  %v916_v46 = vpop.f32.mrb[7].mxu1  ;;  %v919_v49 = vmax.f32 %v868_v35, 0.0  ;;  %v921_v50 = vmax.f32 %v911_v36, 0.0  ;;  %v2616_v29 = vld [vmem:[#allocation4 + $0x37c] ss:$60 sps:$4 sm:$0xff]  }
 0x2da   :  { %v874_v47 = vadd.f32 %v873_v45, %v500_v31  ;;  %v917_v48 = vadd.f32 %v916_v46, %v508_v32  ;;  %v920_v53 = vmax.f32 %v870_v39, 0.0  ;;  %v922_v54 = vmax.f32 %v913_v40, 0.0  ;;  %v2617_v30 = vld [vmem:[#allocation4 + $0x740] ss:$60 sps:$4 sm:$0xff]   ;;  %v2614_v31 = vld [vmem:[#allocation4 + $0x378] ss:$60 sps:$4 sm:$0xff]  }
 0x2db   :  { %v923_v51 = vmax.f32 %v872_v43, 0.0  ;;  %v925_v52 = vmax.f32 %v915_v44, 0.0  ;;  %v2618_v32 = vld [vmem:[#allocation4 + $0x380] ss:$60 sps:$4 sm:$0xff]   ;;  %v2624_v35 = vld [vmem:[#allocation4 + $0x46c] ss:$60 sps:$4 sm:$0xff]  }
 0x2dc   :  { %v924_v55 = vmax.f32 %v874_v47, 0.0  ;;  %v926_v56 = vmax.f32 %v917_v48, 0.0  ;;  %v2622_v36 = vld [vmem:[#allocation4 + $0x468] ss:$60 sps:$4 sm:$0xff]   ;;  %v2625_v38 = vld [vmem:[#allocation4 + $0x4e0] ss:$60 sps:$4 sm:$0xff]  }
 0x2dd   :  { %v2846_v57 = vpack.c.bf16 %v923_v51, %v919_v49  ;;  %v2848_v58 = vpack.c.bf16 %v925_v52, %v921_v50  ;;  %v2630_v39 = vld [vmem:[#allocation4 + $0x55c] ss:$60 sps:$4 sm:$0xff]   ;;  %v2633_v41 = vld [vmem:[#allocation4 + $0x5d4] ss:$60 sps:$4 sm:$0xff]   ;;  %v2636_v43 = vld [vmem:[#allocation4 + $0x64c] ss:$60 sps:$4 sm:$0xff]  }
 0x2de   :  { %v1025_v59 = vpack.c.bf16 %v924_v55, %v920_v53  ;;  %v1700_v60 = vpack.c.bf16 %v926_v56, %v922_v54  ;;  %v2628_v40 = vld [vmem:[#allocation4 + $0x558] ss:$60 sps:$4 sm:$0xff]   ;;  %v2631_v42 = vld [vmem:[#allocation4 + $0x5d0] ss:$60 sps:$4 sm:$0xff]   ;;  %v2634_v44 = vld [vmem:[#allocation4 + $0x648] ss:$60 sps:$4 sm:$0xff]  }
 0x2df   :  { %v2639_v45 = vld [vmem:[#allocation4 + $0x6c4] ss:$60 sps:$4 sm:$0xff]   ;;  %v2642_v47 = vld [vmem:[#allocation4 + $0x73c] ss:$60 sps:$4 sm:$0xff]   ;;  %v1023_v49 = vld [vmem:[#allocation6 + $0x8] sm:$0x3f] }
 0x2e0   :  { %1569 = vmatprep.mubr.bf16.mxu0 %v1025_v59  ;;  %1612 = vmatprep.mubr.bf16.mxu1 %v1025_v59  ;;  %v2637_v46 = vld [vmem:[#allocation4 + $0x6c0] ss:$60 sps:$4 sm:$0xff]   ;;  %v2640_v48 = vld [vmem:[#allocation4 + $0x738] ss:$60 sps:$4 sm:$0xff]   ;;  %v1030_v50 = vrot.slane %v1023_v49, %v2829_v9  ;;  %v1034_v51 = vrot.slane %v1023_v49, %v2832_v11  ;;  %v1038_v53 = vrot.slane %v1023_v49, %v503_v26 }
 0x2e1   :  { %1570 = vmatmul.mubr.bf16.vlgmr.msra.gmra.mrb[8].mxu0 %v2846_v57  ;;  %1613 = vmatmul.mubr.bf16.vlgmr.msra.gmra.mrb[8].mxu1 %v2846_v57 }
 0x2e2   :  { %1624 = vmatpush1.bf16.msra.mxu0 %v2579_v61  ;;  %2297 = vmatpush3.bf16.msra.mxu1 %v2583_v62 }
 0x2e3   :  { %1655 = vmatprep.mubr.bf16.mxu0 %v1025_v59  ;;  %1835 = vmatprep.mubr.bf16.mxu1 %v1700_v60  ;;  %v1042_v60 = vrot.slane %v1023_v49, %v507_v28 }
 0x2e4   :  { %1625 = vmatprep.subr.bf16.mxu0 %v2586_v63  ;;  %2298 = vmatprep.subr.bf16.mxu1 %v2587_v0 }
 0x2e6   :  { %1626 = vmatpush1.bf16.msra.mxu0 %v2584_v1  ;;  %2299 = vmatpush3.bf16.msra.mxu1 %v2588_v2 }
 0x2e7   :  { %1627 = vmatprep.subr.bf16.mxu0 %v2591_v3  ;;  %2300 = vmatprep.subr.bf16.mxu1 %v2592_v4 }
 0x2ea   :  { %1628 = vmatpush1.bf16.msra.mxu0 %v2589_v5  ;;  %2301 = vmatpush3.bf16.msra.mxu1 %v2593_v6 }
 0x2eb   :  { %1629 = vmatprep.subr.bf16.mxu0 %v2596_v10  ;;  %2302 = vmatprep.subr.bf16.mxu1 %v2597_v12 }
 0x2ee   :  { %1630 = vmatpush1.bf16.msra.mxu0 %v2594_v13  ;;  %2303 = vmatpush3.bf16.msra.mxu1 %v2598_v14 }
 0x2ef   :  { %1631 = vmatprep.subr.bf16.mxu0 %v2601_v15  ;;  %2304 = vmatprep.subr.bf16.mxu1 %v2602_v16 }
 0x2f2   :  { %1632 = vmatpush1.bf16.msra.mxu0 %v2599_v17  ;;  %2305 = vmatpush3.bf16.msra.mxu1 %v2603_v18  ;;  %v1045_v18 = vsub.s32 4, %v2826_v8 }
 0x2f3   :  { %1633 = vmatprep.subr.bf16.mxu0 %v2606_v19  ;;  %2306 = vmatprep.subr.bf16.mxu1 %v2607_v20  ;;  %v1049_v19 = vsub.s32 5, %v2826_v8 }
 0x2f4   :  { %v1046_v20 = vrot.slane %v1023_v49, %v1045_v18 }
 0x2f6   :  { %1634 = vmatpush1.bf16.msra.mxu0 %v2604_v21  ;;  %2307 = vmatpush3.bf16.msra.mxu1 %v2608_v22  ;;  %v1050_v21 = vrot.slane %v1023_v49, %v1049_v19 }
 0x2f7   :  { %1635 = vmatprep.subr.bf16.mxu0 %v2611_v23  ;;  %2308 = vmatprep.subr.bf16.mxu1 %v2612_v24 }
 0x2fa   :  { %1636 = vmatpush1.bf16.msra.mxu0 %v2609_v25  ;;  %2309 = vmatpush3.bf16.msra.mxu1 %v2613_v27 }
 0x2fb   :  { %1637 = vmatprep.subr.bf16.mxu0 %v2616_v29  ;;  %2310 = vmatprep.subr.bf16.mxu1 %v2617_v30 }
 0x2fe   :  { %1638 = vmatpush1.bf16.msra.mxu0 %v2614_v31  ;;  %2311 = vmatpush3.bf16.msra.mxu1 %v2618_v32  ;;  %v2278_v32 = vld [vmem:[#allocation6 + $0xe] ss:$0 sm:$0xff] }
 0x2ff   :  { %1639 = vmatprep.subr.bf16.mxu0 %v2621_v33 }
 0x301   :  { %1836 = vmatmul.mubr.bf16.vlgmr.msra.gmra.mrb[12].mxu1 %v2848_v58 }
 0x302   :  { %1640 = vmatpush1.bf16.msra.mxu0 %v2619_v34 }
 0x303   :  { %1641 = vmatprep.subr.bf16.mxu0 %v2624_v35 }
 0x306   :  { %1642 = vmatpush1.bf16.msra.mxu0 %v2622_v36  ;;  %v1862_v36 = vand.u32 127, %v66_v7 }
 0x307   :  { %1643 = vmatprep.subr.bf16.mxu0 %v2627_v37 }
 0x308   :  { %vm1863_vm1 = vcmp.lt.s32.totalorder %v1862_v36, 51 }
 0x30a   :  { %1644 = vmatpush1.bf16.msra.mxu0 %v2625_v38 }
 0x30b   :  { %1645 = vmatprep.subr.bf16.mxu0 %v2630_v39 }
 0x30e   :  { %1646 = vmatpush1.bf16.msra.mxu0 %v2628_v40 }
 0x30f   :  { %1647 = vmatprep.subr.bf16.mxu0 %v2633_v41 }
 0x312   :  { %1648 = vmatpush1.bf16.msra.mxu0 %v2631_v42 }
 0x313   :  { %1649 = vmatprep.subr.bf16.mxu0 %v2636_v43 }
 0x316   :  { %1650 = vmatpush1.bf16.msra.mxu0 %v2634_v44 }
 0x317   :  { %1651 = vmatprep.subr.bf16.mxu0 %v2639_v45 }
 0x31a   :  { %1652 = vmatpush1.bf16.msra.mxu0 %v2637_v46 }
 0x31b   :  { %1653 = vmatprep.subr.bf16.mxu0 %v2642_v47 }
 0x31e   :  { %1654 = vmatpush1.bf16.msra.mxu0 %v2640_v48 }
 0x321   :  { %1656 = vmatmul.mubr.bf16.vlgmr.msra.gmra.mrb[12].mxu0 %v2846_v57 }
 0x3b4   :  { %v1571_v52 = vpop.f32.mrb[8].mxu0  ;;  %v1614_v54 = vpop.f32.mrb[8].mxu1 }
 0x3b5   :  { %v1572_v55 = vadd.f32 %v1571_v52, %v1030_v50  ;;  %v1573_v56 = vpop.f32.mrb[9].mxu0  ;;  %v1616_v58 = vpop.f32.mrb[9].mxu1  ;;  %v1615_v9 = vadd.f32 %v1614_v54, %v1038_v53 }
 0x3b6   :  { %v1574_v59 = vadd.f32 %v1573_v56, %v1034_v51  ;;  %v1575_v61 = vpop.f32.mrb[10].mxu0  ;;  %v1618_v62 = vpop.f32.mrb[10].mxu1  ;;  %v1617_v2 = vadd.f32 %v1616_v58, %v1042_v60 }
 0x3b7   :  { %v1576_v57 = vadd.f32 %v1575_v61, %v1030_v50  ;;  %v1577_v63 = vpop.f32.mrb[11].mxu0  ;;  %v1620_v0 = vpop.f32.mrb[11].mxu1  ;;  %v1619_v4 = vadd.f32 %v1618_v62, %v1038_v53 }
 0x3b8   :  { %v1846_v1 = vadd.f32 %v1574_v59, %v1572_v55  ;;  %v1578_v11 = vadd.f32 %v1577_v63, %v1034_v51  ;;  %v1621_v6 = vadd.f32 %v1620_v0, %v1042_v60 }
 0x3ba   :  { %v1848_v3 = vadd.f32 %v1846_v1, %v1615_v9  ;;  %v1847_v26 = vadd.f32 %v1578_v11, %v1576_v57 }
 0x3bc   :  { %v1850_v5 = vadd.f32 %v1848_v3, %v1617_v2  ;;  %v1849_v10 = vadd.f32 %v1847_v26, %v1619_v4 }
 0x3be   :  { %v1851_v12 = vadd.f32 %v1849_v10, %v1621_v6 }
 0x3d4   :  { %v2312_v13 = vpop.f32.mrb[12].mxu1 }
 0x3d5   :  { %v2313_v14 = vpop.f32.mrb[13].mxu1 }
 0x3d6   :  { %v2314_v15 = vadd.f32 %v2313_v14, %v2312_v13  ;;  %v2315_v28 = vpop.f32.mrb[14].mxu1 }
 0x3d7   :  { %v2316_v16 = vpop.f32.mrb[15].mxu1 }
 0x3d8   :  { %v2317_v17 = vadd.f32 %v2316_v16, %v2315_v28  ;;  %v1838_v37 = vadd.f32 %v2314_v15, %v2278_v32 }
 0x3da   :  { %v1841_v8 = vadd.f32 %v2317_v17, %v2278_v32 }
 0x3f4   :  { %v1657_v22 = vpop.f32.mrb[12].mxu0 }
 0x3f5   :  { %v1658_v23 = vadd.f32 %v1657_v22, %v1046_v20  ;;  %v1659_v24 = vpop.f32.mrb[13].mxu0 }
 0x3f6   :  { %v1660_v25 = vadd.f32 %v1659_v24, %v1050_v21  ;;  %v1661_v27 = vpop.f32.mrb[14].mxu0 }
 0x3f7   :  { %v1852_v29 = vadd.f32 %v1850_v5, %v1658_v23  ;;  %v1662_v30 = vadd.f32 %v1661_v27, %v1046_v20  ;;  %v1663_v31 = vpop.f32.mrb[15].mxu0 }
 0x3f8   :  { %v1664_v33 = vadd.f32 %v1663_v31, %v1050_v21 }
 0x3f9   :  { %v1854_v34 = vadd.f32 %v1852_v29, %v1660_v25  ;;  %v1853_v35 = vadd.f32 %v1851_v12, %v1662_v30 }
 0x3fb   :  { %v1856_v38 = vmul.f32 0.16666667, %v1854_v34  ;;  %v1855_v39 = vadd.f32 %v1853_v35, %v1664_v33 }
 0x3fd   :  { %v1858_v40 = vsub.f32 %v1838_v37, %v1856_v38  ;;  %v1857_v41 = vmul.f32 0.16666667, %v1855_v39 }
 0x3ff   :  { %v1859_v42 = vsub.f32 %v1841_v8, %v1857_v41  ;;  %v1902_v43 = vadd.f32 %v1858_v40, %v1574_v59  ;;  %v1864_v44 = vadd.f32 %v1858_v40, %v1572_v55  ;;  %v1932_v45 = vadd.f32 %v1858_v40, %v1615_v9 }
 0x400   :  { %v1962_v46 = vadd.f32 %v1858_v40, %v1617_v2  ;;  %v1992_v47 = vadd.f32 %v1858_v40, %v1658_v23  ;;  %v2022_v48 = vadd.f32 %v1858_v40, %v1660_v25 }
 0x401   :  { %v1904_v49 = vsel %vm1863_vm1, %v1902_v43, -1e+30  ;;  %v1868_v50 = vsel %vm1863_vm1, %v1864_v44, -1e+30  ;;  %v1903_v51 = vadd.f32 %v1859_v42, %v1578_v11  ;;  %v1933_v7 = vadd.f32 %v1859_v42, %v1619_v4 }
 0x402   :  { %1906 = vmax.xlane.f32.xlu1 %v1904_v49  ;;  %1870 = vmax.xlane.f32.xlu0 %v1868_v50  ;;  %v1963_v52 = vadd.f32 %v1859_v42, %v1621_v6  ;;  %v1993_v53 = vadd.f32 %v1859_v42, %v1662_v30  ;;  %v1865_v54 = vadd.f32 %v1859_v42, %v1576_v57  ;;  %v1934_v55 = vsel %vm1863_vm1, %v1932_v45, -1e+30 }
 0x403   :  { %v2023_v56 = vadd.f32 %v1859_v42, %v1664_v33  ;;  %v1905_v58 = vsel %vm1863_vm1, %v1903_v51, -1e+30  ;;  %v1935_v59 = vsel %vm1863_vm1, %v1933_v7, -1e+30  ;;  %v1964_v60 = vsel %vm1863_vm1, %v1962_v46, -1e+30 }
 0x404   :  { %v1965_v61 = vsel %vm1863_vm1, %v1963_v52, -1e+30  ;;  %v1994_v62 = vsel %vm1863_vm1, %v1992_v47, -1e+30  ;;  %v2872_v57 = vsel %vm1863_vm1, %v1993_v53, -1e+30 }
 0x405   :  { %v1869_v63 = vsel %vm1863_vm1, %v1865_v54, -1e+30  ;;  %v2877_v0 = vsel %vm1863_vm1, %v2023_v56, -1e+30  ;;  %v2024_v9 = vsel %vm1863_vm1, %v2022_v48, -1e+30 }
 0x406   :  { %1908 = vmax.xlane.f32.xlu1 %v1905_v58  ;;  %1936 = vmax.xlane.f32.xlu0 %v1934_v55 }
 0x40a   :  { %1938 = vmax.xlane.f32.xlu1 %v1935_v59  ;;  %1966 = vmax.xlane.f32.xlu0 %v1964_v60 }
 0x40e   :  { %1968 = vmax.xlane.f32.xlu1 %v1965_v61  ;;  %1996 = vmax.xlane.f32.xlu0 %v1994_v62 }
 0x412   :  { %1998 = vmax.xlane.f32.xlu1 %v2872_v57  ;;  %1872 = vmax.xlane.f32.xlu0 %v1869_v63 }
 0x416   :  { %2028 = vmax.xlane.f32.xlu1 %v2877_v0  ;;  %2026 = vmax.xlane.f32.xlu0 %v2024_v9 }
 0x48f   :  { %v1907_v1 = vpop.xlane.xlu1 %1906  ;;  %v1871_v11 = vpop.xlane.xlu0 %1870 }
 0x490   :  { %v1874_v2 = vsub.f32 %v1868_v50, %v1871_v11  ;;  %v1910_v3 = vsub.f32 %v1904_v49, %v1907_v1 }
 0x492   :  { %v1876_v4 = vmul.f32 1.442695, %v1874_v2  ;;  %v1912_v5 = vmul.f32 1.442695, %v1910_v3 }
 0x493   :  { %v1937_v26 = vpop.xlane.xlu0 %1936  ;;  %v1909_v10 = vpop.xlane.xlu1 %1908 }
 0x494   :  { %2643 = vpow2.f32 %v1876_v4  ;;  %v1940_v6 = vsub.f32 %v1934_v55, %v1937_v26  ;;  %v1911_v20 = vsub.f32 %v1905_v58, %v1909_v10  ;;  %v2904_v58 = vld [vmem:[#allocation6 + $0xf] ss:$0 sm:$0xff] }
 0x495   :  { %2645 = vpow2.f32 %v1912_v5 }
 0x496   :  { %v1942_v13 = vmul.f32 1.442695, %v1940_v6  ;;  %v1914_v29 = vmul.f32 1.442695, %v1911_v20 }
 0x497   :  { %v1967_v12 = vpop.xlane.xlu0 %1966  ;;  %v1939_v28 = vpop.xlane.xlu1 %1938 }
 0x498   :  { %v1970_v14 = vsub.f32 %v1964_v60, %v1967_v12  ;;  %2647 = vpow2.f32 %v1942_v13  ;;  %v1941_v31 = vsub.f32 %v1935_v59, %v1939_v28 }
 0x49a   :  { %v1972_v17 = vmul.f32 1.442695, %v1970_v14  ;;  %v1944_v35 = vmul.f32 1.442695, %v1941_v31 }
 0x49b   :  { %v1997_v15 = vpop.xlane.xlu0 %1996  ;;  %v1969_v23 = vpop.xlane.xlu1 %1968 }
 0x49c   :  { %v2000_v16 = vsub.f32 %v1994_v62, %v1997_v15  ;;  %2649 = vpow2.f32 %v1972_v17  ;;  %v1971_v36 = vsub.f32 %v1965_v61, %v1969_v23 }
 0x49e   :  { %v2644_v18 = vpop.eup %2643  ;;  %v2002_v21 = vmul.f32 1.442695, %v2000_v16  ;;  %v1974_v38 = vmul.f32 1.442695, %v1971_v36 }
 0x49f   :  { %v1873_v19 = vpop.xlane.xlu0 %1872  ;;  %1880 = vadd.xlane.f32.xlu0 %v2644_v18  ;;  %v2646_v25 = vpop.eup %2645 }
 0x4a0   :  { %v1875_v22 = vsub.f32 %v1869_v63, %v1873_v19  ;;  %2651 = vpow2.f32 %v2002_v21  ;;  %v1999_v34 = vpop.xlane.xlu1 %1998 }
 0x4a1   :  { %v2001_v39 = vsub.f32 %v2872_v57, %v1999_v34 }
 0x4a2   :  { %v1878_v24 = vmul.f32 1.442695, %v1875_v22  ;;  %v2648_v33 = vpop.eup %2647 }
 0x4a3   :  { %v2027_v27 = vpop.xlane.xlu0 %2026  ;;  %1916 = vadd.xlane.f32.xlu0 %v2646_v25  ;;  %v2004_v42 = vmul.f32 1.442695, %v2001_v39 }
 0x4a4   :  { %v2030_v30 = vsub.f32 %v2024_v9, %v2027_v27  ;;  %2653 = vpow2.f32 %v1878_v24  ;;  %v2029_v40 = vpop.xlane.xlu1 %2028 }
 0x4a5   :  { %2655 = vpow2.f32 %v1914_v29  ;;  %v2031_v43 = vsub.f32 %v2877_v0, %v2029_v40 }
 0x4a6   :  { %v2032_v32 = vmul.f32 1.442695, %v2030_v30  ;;  %v2650_v37 = vpop.eup %2649 }
 0x4a7   :  { %1946 = vadd.xlane.f32.xlu0 %v2648_v33  ;;  %v2034_v46 = vmul.f32 1.442695, %v2031_v43 }
 0x4a8   :  { %2657 = vpow2.f32 %v2032_v32 }
 0x4a9   :  { %2659 = vpow2.f32 %v1944_v35 }
 0x4aa   :  { %v2882_v8 = vpop.eup %2651  ;;  %2661 = vpow2.f32 %v1974_v38 }
 0x4ab   :  { %1976 = vadd.xlane.f32.xlu0 %v2650_v37  ;;  %2663 = vpow2.f32 %v2004_v42 }
 0x4ac   :  { %2665 = vpow2.f32 %v2034_v46 }
 0x4ae   :  { %v2654_v41 = vpop.eup %2653 }
 0x4af   :  { %2006 = vadd.xlane.f32.xlu0 %v2882_v8  ;;  %1882 = vadd.xlane.f32.xlu1 %v2654_v41  ;;  %v2886_v44 = vpop.eup %2655 }
 0x4b2   :  { %v2888_v45 = vpop.eup %2657 }
 0x4b3   :  { %1918 = vadd.xlane.f32.xlu1 %v2886_v44  ;;  %2036 = vadd.xlane.f32.xlu0 %v2888_v45  ;;  %v2892_v47 = vpop.eup %2659 }
 0x4b4   :  { %v2895_v48 = vpop.eup %2661 }
 0x4b5   :  { %v2898_v49 = vpop.eup %2663 }
 0x4b6   :  { %v2901_v50 = vpop.eup %2665 }
 0x4b7   :  { %1948 = vadd.xlane.f32.xlu1 %v2892_v47 }
 0x4bb   :  { %1978 = vadd.xlane.f32.xlu1 %v2895_v48 }
 0x4bf   :  { %2008 = vadd.xlane.f32.xlu1 %v2898_v49 }
 0x4c3   :  { %2038 = vadd.xlane.f32.xlu1 %v2901_v50 }
 0x52c   :  { %v1881_v51 = vpop.xlane.xlu0 %1880 }
 0x52d   :  { %2667 = vrcp.f32 %v1881_v51 }
 0x530   :  { %v1917_v7 = vpop.xlane.xlu0 %1916 }
 0x531   :  { %2669 = vrcp.f32 %v1917_v7 }
 0x534   :  { %v1947_v52 = vpop.xlane.xlu0 %1946 }
 0x535   :  { %2671 = vrcp.f32 %v1947_v52 }
 0x537   :  { %v2668_v53 = vpop.eup %2667 }
 0x538   :  { %v1977_v54 = vpop.xlane.xlu0 %1976  ;;  %v1886_v56 = vmul.f32 %v2668_v53, %v2644_v18 }
 0x539   :  { %2673 = vrcp.f32 %v1977_v54 }
 0x53a   :  { %v1888_v55 = vmax.f32 %v1886_v56, 0.001 }
 0x53b   :  { %v2670_v59 = vpop.eup %2669 }
 0x53c   :  { %v1883_v60 = vpop.xlane.xlu1 %1882  ;;  %v2007_v61 = vpop.xlane.xlu0 %2006  ;;  %v1896_v62 = vmul.f32 %v2904_v58, %v1888_v55  ;;  %v1922_v57 = vmul.f32 %v2670_v59, %v2646_v25 }
 0x53d   :  { %2675 = vrcp.f32 %v1883_v60 }
 0x53e   :  { %2677 = vrcp.f32 %v2007_v61  ;;  %1898 = vadd.xlane.f32.xlu0 %v1896_v62  ;;  %v1924_v63 = vmax.f32 %v1922_v57, 0.001 }
 0x53f   :  { %v2672_v0 = vpop.eup %2671 }
 0x540   :  { %v1919_v9 = vpop.xlane.xlu1 %1918  ;;  %v2037_v1 = vpop.xlane.xlu0 %2036  ;;  %v1926_v11 = vmul.f32 %v2904_v58, %v1924_v63  ;;  %v1952_v2 = vmul.f32 %v2672_v0, %v2648_v33 }
 0x541   :  { %2679 = vrcp.f32 %v1919_v9 }
 0x542   :  { %2681 = vrcp.f32 %v2037_v1  ;;  %1928 = vadd.xlane.f32.xlu0 %v1926_v11  ;;  %v1954_v3 = vmax.f32 %v1952_v2, 0.001 }
 0x543   :  { %v2674_v4 = vpop.eup %2673 }
 0x544   :  { %v1949_v26 = vpop.xlane.xlu1 %1948  ;;  %v1956_v5 = vmul.f32 %v2904_v58, %v1954_v3  ;;  %v1982_v6 = vmul.f32 %v2674_v4, %v2650_v37 }
 0x545   :  { %2683 = vrcp.f32 %v1949_v26 }
 0x546   :  { %1958 = vadd.xlane.f32.xlu0 %v1956_v5  ;;  %v1984_v10 = vmax.f32 %v1982_v6, 0.001 }
 0x547   :  { %v2676_v12 = vpop.eup %2675 }
 0x548   :  { %v2678_v13 = vpop.eup %2677  ;;  %v1979_v14 = vpop.xlane.xlu1 %1978  ;;  %v1986_v15 = vmul.f32 %v2904_v58, %v1984_v10  ;;  %v1887_v28 = vmul.f32 %v2676_v12, %v2654_v41 }
 0x549   :  { %2685 = vrcp.f32 %v1979_v14  ;;  %v2012_v16 = vmul.f32 %v2678_v13, %v2882_v8 }
 0x54a   :  { %1988 = vadd.xlane.f32.xlu0 %v1986_v15  ;;  %v1889_v17 = vmax.f32 %v1887_v28, 0.001 }
 0x54b   :  { %v2680_v18 = vpop.eup %2679  ;;  %v2014_v19 = vmax.f32 %v2012_v16, 0.001 }
 0x54c   :  { %v2682_v20 = vpop.eup %2681  ;;  %v2009_v21 = vpop.xlane.xlu1 %2008  ;;  %v1897_v22 = vmul.f32 %v2904_v58, %v1889_v17  ;;  %v1923_v23 = vmul.f32 %v2680_v18, %v2886_v44 }
 0x54d   :  { %2687 = vrcp.f32 %v2009_v21  ;;  %v2016_v24 = vmul.f32 %v2904_v58, %v2014_v19  ;;  %v2042_v25 = vmul.f32 %v2682_v20, %v2888_v45 }
 0x54e   :  { %1900 = vadd.xlane.f32.xlu1 %v1897_v22  ;;  %v1925_v27 = vmax.f32 %v1923_v23, 0.001 }
 0x54f   :  { %v2684_v29 = vpop.eup %2683  ;;  %2018 = vadd.xlane.f32.xlu0 %v2016_v24  ;;  %v2044_v30 = vmax.f32 %v2042_v25, 0.001 }
 0x550   :  { %v2039_v31 = vpop.xlane.xlu1 %2038  ;;  %v1927_v32 = vmul.f32 %v2904_v58, %v1925_v27  ;;  %v1953_v33 = vmul.f32 %v2684_v29, %v2892_v47 }
 0x551   :  { %2689 = vrcp.f32 %v2039_v31  ;;  %v2046_v34 = vmul.f32 %v2904_v58, %v2044_v30 }
 0x552   :  { %1930 = vadd.xlane.f32.xlu1 %v1927_v32  ;;  %v1955_v35 = vmax.f32 %v1953_v33, 0.001 }
 0x553   :  { %v2686_v36 = vpop.eup %2685  ;;  %2048 = vadd.xlane.f32.xlu0 %v2046_v34 }
 0x554   :  { %v1957_v37 = vmul.f32 %v2904_v58, %v1955_v35  ;;  %v1983_v38 = vmul.f32 %v2686_v36, %v2895_v48 }
 0x556   :  { %1960 = vadd.xlane.f32.xlu1 %v1957_v37  ;;  %v1985_v39 = vmax.f32 %v1983_v38, 0.001 }
 0x557   :  { %v2688_v8 = vpop.eup %2687 }
 0x558   :  { %v1987_v40 = vmul.f32 %v2904_v58, %v1985_v39  ;;  %v2013_v41 = vmul.f32 %v2688_v8, %v2898_v49 }
 0x55a   :  { %1990 = vadd.xlane.f32.xlu1 %v1987_v40  ;;  %v2015_v42 = vmax.f32 %v2013_v41, 0.001 }
 0x55b   :  { %v2690_v43 = vpop.eup %2689 }
 0x55c   :  { %v2017_v44 = vmul.f32 %v2904_v58, %v2015_v42  ;;  %v2043_v45 = vmul.f32 %v2690_v43, %v2901_v50 }
 0x55e   :  { %2020 = vadd.xlane.f32.xlu1 %v2017_v44  ;;  %v2045_v46 = vmax.f32 %v2043_v45, 0.001 }
 0x560   :  { %v2047_v47 = vmul.f32 %v2904_v58, %v2045_v46 }
 0x562   :  { %2050 = vadd.xlane.f32.xlu1 %v2047_v47 }
 0x5cb   :  { %v1899_v48 = vpop.xlane.xlu0 %1898 }
 0x5cf   :  { %v1929_v51 = vpop.xlane.xlu0 %1928 }
 0x5d0   :  { %v2053_v54 = vsel %vm2052_vm2, %v1899_v48, %v1929_v51 }
 0x5d3   :  { %v1959_v7 = vpop.xlane.xlu0 %1958 }
 0x5d4   :  { %v2056_v56 = vsel %vm2055_vm3, %v2053_v54, %v1959_v7 }
 0x5d7   :  { %v1989_v52 = vpop.xlane.xlu0 %1988 }
 0x5d8   :  { %v2059_v50 = vsel %vm2058_vm4, %v2056_v56, %v1989_v52 }
 0x5db   :  { %v1901_v53 = vpop.xlane.xlu1 %1900 }
 0x5dc   :  { %v2019_v49 = vpop.xlane.xlu0 %2018 }
 0x5dd   :  { %v2062_v58 = vsel %vm2061_vm5, %v2059_v50, %v2019_v49 }
 0x5df   :  { %v1931_v55 = vpop.xlane.xlu1 %1930 }
 0x5e0   :  { %v2049_v59 = vpop.xlane.xlu0 %2048  ;;  %v2054_v63 = vsel %vm2052_vm2, %v1901_v53, %v1931_v55 }
 0x5e1   :  { %v2065_v60 = vsel %vm2064_vm6, %v2062_v58, %v2049_v59 }
 0x5e2   :  { %2068 = vst.msk [vmem:[%s2944_s3] sm:$0xff] %vm2067_vm7, %v2065_v60 }
 0x5e3   :  { %v1961_v61 = vpop.xlane.xlu1 %1960 }
 0x5e4   :  { %v2057_v0 = vsel %vm2055_vm3, %v2054_v63, %v1961_v61 }
 0x5e7   :  { %v1991_v62 = vpop.xlane.xlu1 %1990 }
 0x5e8   :  { %v2060_v9 = vsel %vm2058_vm4, %v2057_v0, %v1991_v62 }
 0x5eb   :  { %v2021_v57 = vpop.xlane.xlu1 %2020 }
 0x5ec   :  { %v2063_v1 = vsel %vm2061_vm5, %v2060_v9, %v2021_v57 }
 0x5ef   :  { %v2051_v11 = vpop.xlane.xlu1 %2050 }
 0x5f0   :  { %v2066_v2 = vsel %vm2064_vm6, %v2063_v1, %v2051_v11 }
 0x5f1   :  { %2069 = vst.msk [vmem:[%s2944_s3 + $0x8] sm:$0xff] %vm2067_vm7, %v2066_v2 }
 0x5f2   :  { %2074 = vsyncpa [#allocation3], 1 }
 0x5f3   :  { %2075 = vsyncpa [#allocation5], 1 }

</bundles_post_ra>
